<compile_context>
chip_gen: v6e
topology: v6e:2x2x1
jax: 0.10.0
libtpu: 0.0.40
codegen_flags: <defaults>
</compile_context>

<pallas_src>
import math
import functools

import jax
import jax.numpy as jnp
from jax.experimental import pallas as pl
from jax.experimental.pallas import tpu as pltpu


# ----------------------------- in-kernel helpers -----------------------------

def _layer_norm(x, g, b, eps):
    # matches torch.nn.LayerNorm (biased variance over last dim), f32 math
    mu = jnp.mean(x, axis=-1, keepdims=True)
    var = jnp.mean((x - mu) ** 2, axis=-1, keepdims=True)
    return (x - mu) / jnp.sqrt(var + eps) * g + b


def _gelu_exact(x):
    # matches torch.nn.GELU() (exact erf form, approximate='none')
    return 0.5 * x * (1.0 + jax.lax.erf(x * (1.0 / math.sqrt(2.0))))


# ----------------------------- Pallas kernel ----------------------------------

def gpt2_stack_kernel(x_ref, maskb_ref,
                      wqkv_ref, bqkv_ref, wad_ref, bad_ref, ln1g_ref, ln1b_ref,
                      wi_ref, bi_ref, wo_ref, bo_ref, ln2g_ref, ln2b_ref,
                      lnfg_ref, lnfb_ref,
                      out_ref, ctx_ref, *, num_heads, head_size, eps):
    """One (batch b, layer l) grid step of the transformer stack.

    The hidden state is carried in out_ref (same output block revisited across
    the layer axis, so it stays resident in VMEM for all L layers of a batch
    element and is written back to HBM only once per batch element).
    """
    l = pl.program_id(1)
    n_layers = pl.num_programs(1)
    H = num_heads * head_size

    # Layer 0: seed the resident hidden-state block from the embeddings.
    @pl.when(l == 0)
    def _():
        out_ref[0] = x_ref[0]

    x = out_ref[0]                       # (S, H) f32 carrier
    x_bf = x.astype(jnp.bfloat16)
    mask_bias = maskb_ref[0]             # (1, S) f32, broadcast over query rows

    # ---- fused QKV projection: one (S,H) x (H,3H) MXU launch ----
    qkv = jnp.dot(x_bf, wqkv_ref[0],
                  preferred_element_type=jnp.float32) + bqkv_ref[0]   # (S, 3H) f32
    q = qkv[:, 0 * H:1 * H].astype(jnp.bfloat16)
    k = qkv[:, 1 * H:2 * H].astype(jnp.bfloat16)
    v = qkv[:, 2 * H:3 * H].astype(jnp.bfloat16)

    # ---- multi-head self-attention ----
    scale = 1.0 / math.sqrt(head_size)
    # contract the head feature dim of both operands: q . k^T without a
    # physical transpose (no XLU vxpose competing with vmatmul pushes).
    dn_scores = (((1,), (1,)), ((), ()))
    for h in range(num_heads):           # static unroll; small head count
        s0 = h * head_size
        qh = q[:, s0:s0 + head_size]
        kh = k[:, s0:s0 + head_size]
        vh = v[:, s0:s0 + head_size]
        scores = jax.lax.dot_general(
            qh, kh, dn_scores, preferred_element_type=jnp.float32) * scale
        scores = scores + mask_bias                    # padding mask only (spec)
        scores = scores - jnp.max(scores, axis=-1, keepdims=True)
        p = jnp.exp(scores)
        p = p * pl.reciprocal(jnp.sum(p, axis=-1, keepdims=True), approx=True)
        # write this head's context into its lane slice of the scratch buffer
        # (replaces jnp.concatenate; head's registers die right here).
        ctx_ref[:, s0:s0 + head_size] = jnp.dot(
            p.astype(jnp.bfloat16), vh,
            preferred_element_type=jnp.float32).astype(jnp.bfloat16)

    # ---- attention_dense + residual + LayerNorm (post-norm, as in the spec) --
    attn_out = jnp.dot(ctx_ref[...], wad_ref[0],
                       preferred_element_type=jnp.float32) + bad_ref[0]
    h1 = _layer_norm(x + attn_out, ln1g_ref[0], ln1b_ref[0], eps)

    # ---- MLP: interm_dense -> GELU -> out_dense, + residual + LayerNorm -----
    inter = _gelu_exact(jnp.dot(h1.astype(jnp.bfloat16), wi_ref[0],
                                preferred_element_type=jnp.float32) + bi_ref[0])
    mlp_out = jnp.dot(inter.astype(jnp.bfloat16), wo_ref[0],
                      preferred_element_type=jnp.float32) + bo_ref[0]
    y = _layer_norm(h1 + mlp_out, ln2g_ref[0], ln2b_ref[0], eps)

    out_ref[0] = y

    # Fuse the final LayerNorm into the last layer's step (saves a full extra
    # HBM read+write of the (B,S,H) activations).
    @pl.when(l == n_layers - 1)
    def _():
        out_ref[0] = _layer_norm(y, lnfg_ref[...], lnfb_ref[...], eps)


# ----------------------------- kernel wrapper ----------------------------------

def run_gpt2_stack(x, mask_bias, sp, lnf_g, lnf_b, num_heads, eps):
    B, S, H = x.shape
    L = sp['w_qkv'].shape[0]
    I = sp['w_in'].shape[2]

    bmap = lambda b, l: (b, 0, 0)   # per-batch blocks (constant over l -> one DMA per b)
    lmap = lambda b, l: (l, 0, 0)   # per-layer blocks (pipeline prefetches layer l+1)
    cmap = lambda b, l: (0, 0)      # constants (final LN params)

    in_specs = [
        pl.BlockSpec((1, S, H), bmap),            # layer-0 hidden states
        pl.BlockSpec((1, 1, S), bmap),            # extended attention mask (key axis)
        pl.BlockSpec((1, H, 3 * H), lmap),        # fused Wqkv  (bf16)
        pl.BlockSpec((1, 1, 3 * H), lmap),        # fused bqkv
        pl.BlockSpec((1, H, H), lmap),            # attention_dense W (bf16)
        pl.BlockSpec((1, 1, H), lmap),            # attention_dense b
        pl.BlockSpec((1, 1, H), lmap),            # ln1 gamma
        pl.BlockSpec((1, 1, H), lmap),            # ln1 beta
        pl.BlockSpec((1, H, I), lmap),            # interm_dense W (bf16)
        pl.BlockSpec((1, 1, I), lmap),            # interm_dense b
        pl.BlockSpec((1, I, H), lmap),            # out_dense W (bf16)
        pl.BlockSpec((1, 1, H), lmap),            # out_dense b
        pl.BlockSpec((1, 1, H), lmap),            # ln2 gamma
        pl.BlockSpec((1, 1, H), lmap),            # ln2 beta
        pl.BlockSpec((1, H), cmap),               # final LN gamma
        pl.BlockSpec((1, H), cmap),               # final LN beta
    ]
    kernel = functools.partial(gpt2_stack_kernel, num_heads=num_heads,
                               head_size=H // num_heads, eps=eps)
    return pl.pallas_call(
        kernel,
        out_shape=jax.ShapeDtypeStruct((B, S, H), jnp.float32),
        grid_spec=pltpu.PrefetchScalarGridSpec(
            num_scalar_prefetch=0,
            grid=(B, L),                          # layer axis innermost
            in_specs=in_specs,
            out_specs=pl.BlockSpec((1, S, H), bmap),
            scratch_shapes=[pltpu.VMEM((S, H), jnp.bfloat16)],   # per-head ctx
        ),
        compiler_params=pltpu.CompilerParams(
            dimension_semantics=("parallel", "arbitrary"),
            vmem_limit_bytes=48 * 1024 * 1024,
        ),
    )(x, mask_bias,
      sp['w_qkv'], sp['b_qkv'], sp['w_attn'], sp['b_attn'],
      sp['ln1_g'], sp['ln1_b'],
      sp['w_in'], sp['b_in'], sp['w_out'], sp['b_out'],
      sp['ln2_g'], sp['ln2_b'],
      lnf_g, lnf_b)


# ----------------------------- parameter init ----------------------------------

def init_params(key, vocab, maxpos, H, I, L, std=0.02):
    keys = jax.random.split(key, 7)
    nrm = jax.random.normal
    bf16 = jnp.bfloat16
    params = {
        'word_emb': std * nrm(keys[0], (vocab, H), jnp.float32),
        'pos_emb': std * nrm(keys[1], (maxpos, H), jnp.float32),
        'lnf_g': jnp.ones((1, H), jnp.float32),
        'lnf_b': jnp.zeros((1, H), jnp.float32),
        # per-layer weights stacked along a leading L axis (one pallas_call for
        # the whole stack); matmul weights stored in bf16, LN/bias in f32.
        'stack': {
            'w_qkv': (std * nrm(keys[2], (L, H, 3 * H), jnp.float32)).astype(bf16),
            'b_qkv': jnp.zeros((L, 1, 3 * H), jnp.float32),
            'w_attn': (std * nrm(keys[3], (L, H, H), jnp.float32)).astype(bf16),
            'b_attn': jnp.zeros((L, 1, H), jnp.float32),
            'ln1_g': jnp.ones((L, 1, H), jnp.float32),
            'ln1_b': jnp.zeros((L, 1, H), jnp.float32),
            'w_in': (std * nrm(keys[4], (L, H, I), jnp.float32)).astype(bf16),
            'b_in': jnp.zeros((L, 1, I), jnp.float32),
            'w_out': (std * nrm(keys[5], (L, I, H), jnp.float32)).astype(bf16),
            'b_out': jnp.zeros((L, 1, H), jnp.float32),
            'ln2_g': jnp.ones((L, 1, H), jnp.float32),
            'ln2_b': jnp.zeros((L, 1, H), jnp.float32),
        },
    }
    return params


# ----------------------------- model forward -----------------------------------

def gpt2_model_forward(input_ids, attention_mask, params, config):
    B, S = input_ids.shape

    # embed: word + positional embeddings (gather glue in plain JAX).
    hidden = (jnp.take(params['word_emb'], input_ids, axis=0)
              + params['pos_emb'][:S][None, :, :])
    # TODO(synk): dropout layers are identity here (inference semantics).

    # get_extended_attention_mask: (1 - mask) * finfo(float32).min (key axis),
    # matching the PyTorch spec exactly.
    neg = jnp.finfo(jnp.float32).min
    mask_bias = ((1.0 - attention_mask.astype(jnp.float32)) * neg).reshape(B, 1, S)

    seq_out = run_gpt2_stack(hidden, mask_bias, params['stack'],
                             params['lnf_g'], params['lnf_b'],
                             config['num_heads'], config['eps'])

    last_idx = jnp.sum(attention_mask, axis=1).astype(jnp.int32) - 1
    last_token = seq_out[jnp.arange(B), last_idx]
    return {'last_hidden_state': seq_out, 'last_token': last_token}


# ----------------------------- main ---------------------------------------------

if __name__ == "__main__":
    key = jax.random.PRNGKey(0)

    # Small GPT2-like config with lane-dense hidden dims:
    # B=2, seq=16, hidden=128, 4 heads (head_size=32), 2 layers, ffn=512.
    B, S, H, NH, L = 2, 16, 128, 4, 2
    I = 4 * H
    VOCAB, MAXPOS = 101, 32
    config = dict(hidden_size=H, num_heads=NH, eps=1e-5)

    params = init_params(key, VOCAB, MAXPOS, H, I, L)

    ids_key = jax.random.fold_in(key, 123)
    input_ids = jax.random.randint(ids_key, (B, S), 0, VOCAB)
    attention_mask = jnp.array([[1] * 11 + [0] * 5,
                                [1] * 7 + [0] * 9], dtype=jnp.float32)

    out = gpt2_model_forward(input_ids, attention_mask, params, config)
    jax.block_until_ready(out)

    assert out['last_hidden_state'].shape == (B, S, H)
    assert out['last_token'].shape == (B, H)
    print("KERNEL_OK")
</pallas_src>

<mosaic_0001>
module attributes {stable_mosaic.version = 11 : i64} {
  func.func @gpt2_stack_kernel(%arg0: i32, %arg1: i32, %arg2: memref<1x16x128xf32, #tpu.memory_space<vmem>>, %arg3: memref<1x1x16xf32, #tpu.memory_space<vmem>>, %arg4: memref<1x128x384xbf16, #tpu.memory_space<vmem>>, %arg5: memref<1x1x384xf32, #tpu.memory_space<vmem>>, %arg6: memref<1x128x128xbf16, #tpu.memory_space<vmem>>, %arg7: memref<1x1x128xf32, #tpu.memory_space<vmem>>, %arg8: memref<1x1x128xf32, #tpu.memory_space<vmem>>, %arg9: memref<1x1x128xf32, #tpu.memory_space<vmem>>, %arg10: memref<1x128x512xbf16, #tpu.memory_space<vmem>>, %arg11: memref<1x1x512xf32, #tpu.memory_space<vmem>>, %arg12: memref<1x512x128xbf16, #tpu.memory_space<vmem>>, %arg13: memref<1x1x128xf32, #tpu.memory_space<vmem>>, %arg14: memref<1x1x128xf32, #tpu.memory_space<vmem>>, %arg15: memref<1x1x128xf32, #tpu.memory_space<vmem>>, %arg16: memref<1x128xf32, #tpu.memory_space<vmem>>, %arg17: memref<1x128xf32, #tpu.memory_space<vmem>>, %arg18: memref<1x16x128xf32, #tpu.memory_space<vmem>>, %arg19: memref<16x128xbf16, #tpu.memory_space<vmem>>) attributes {dimension_semantics = [#tpu.dimension_semantics<parallel>, #tpu.dimension_semantics<arbitrary>], iteration_bounds = array<i64: 2, 2>, scalar_prefetch = 0 : i64, scratch_operands = 1 : i64, tpu.core_type = #tpu.core_type<tc>, window_params = [{transform_indices = @transform_0, window_bounds = array<i64: 1, 16, 128>}, {transform_indices = @transform_1, window_bounds = array<i64: 1, 1, 16>}, {transform_indices = @transform_2, window_bounds = array<i64: 1, 128, 384>}, {transform_indices = @transform_3, window_bounds = array<i64: 1, 1, 384>}, {transform_indices = @transform_4, window_bounds = array<i64: 1, 128, 128>}, {transform_indices = @transform_5, window_bounds = array<i64: 1, 1, 128>}, {transform_indices = @transform_6, window_bounds = array<i64: 1, 1, 128>}, {transform_indices = @transform_7, window_bounds = array<i64: 1, 1, 128>}, {transform_indices = @transform_8, window_bounds = array<i64: 1, 128, 512>}, {transform_indices = @transform_9, window_bounds = array<i64: 1, 1, 512>}, {transform_indices = @transform_10, window_bounds = array<i64: 1, 512, 128>}, {transform_indices = @transform_11, window_bounds = array<i64: 1, 1, 128>}, {transform_indices = @transform_12, window_bounds = array<i64: 1, 1, 128>}, {transform_indices = @transform_13, window_bounds = array<i64: 1, 1, 128>}, {pipeline_mode = #tpu.pipeline_mode<synchronous>, transform_indices = @transform_14, window_bounds = array<i64: 1, 128>}, {pipeline_mode = #tpu.pipeline_mode<synchronous>, transform_indices = @transform_15, window_bounds = array<i64: 1, 128>}, {transform_indices = @transform_16, window_bounds = array<i64: 1, 16, 128>}]} {
    %c0_i32 = arith.constant 0 : i32
    %0 = arith.cmpi eq, %arg1, %c0_i32 : i32
    %1 = arith.extui %0 : i1 to i32
    %c0_i32_0 = arith.constant 0 : i32
    %2 = arith.cmpi ne, %1, %c0_i32_0 : i32
    scf.if %2 {
      %c0_89 = arith.constant 0 : index
      %c0_90 = arith.constant 0 : index
      %c0_91 = arith.constant 0 : index
      %201 = vector.load %arg2[%c0_89, %c0_90, %c0_91] : memref<1x16x128xf32, #tpu.memory_space<vmem>>, vector<1x16x128xf32>
      %202 = vector.shape_cast %201 : vector<1x16x128xf32> to vector<16x128xf32>
      %c0_92 = arith.constant 0 : index
      %c0_93 = arith.constant 0 : index
      %c0_94 = arith.constant 0 : index
      %203 = vector.load %arg18[%c0_92, %c0_93, %c0_94] : memref<1x16x128xf32, #tpu.memory_space<vmem>>, vector<1x16x128xf32>
      %204 = vector.shape_cast %203 : vector<1x16x128xf32> to vector<16x128xf32>
      %205 = vector.shape_cast %202 : vector<16x128xf32> to vector<1x16x128xf32>
      tpu.vector_store %arg18[%c0_92, %c0_93, %c0_94], %205 {strides = array<i32>} : memref<1x16x128xf32, #tpu.memory_space<vmem>>, vector<1x16x128xf32>,
    } else {
    }
    %c0 = arith.constant 0 : index
    %c0_1 = arith.constant 0 : index
    %c0_2 = arith.constant 0 : index
    %3 = vector.load %arg18[%c0, %c0_1, %c0_2] : memref<1x16x128xf32, #tpu.memory_space<vmem>>, vector<1x16x128xf32>
    %4 = vector.shape_cast %3 : vector<1x16x128xf32> to vector<16x128xf32>
    %5 = arith.truncf %4 : vector<16x128xf32> to vector<16x128xbf16>
    %c0_3 = arith.constant 0 : index
    %c0_4 = arith.constant 0 : index
    %c0_5 = arith.constant 0 : index
    %6 = vector.load %arg3[%c0_3, %c0_4, %c0_5] : memref<1x1x16xf32, #tpu.memory_space<vmem>>, vector<1x1x16xf32>
    %7 = vector.shape_cast %6 : vector<1x1x16xf32> to vector<1x16xf32>
    %c0_6 = arith.constant 0 : index
    %c0_7 = arith.constant 0 : index
    %c0_8 = arith.constant 0 : index
    %8 = vector.load %arg4[%c0_6, %c0_7, %c0_8] : memref<1x128x384xbf16, #tpu.memory_space<vmem>>, vector<1x128x384xbf16>
    %9 = vector.shape_cast %8 : vector<1x128x384xbf16> to vector<128x384xbf16>
    %cst = arith.constant dense<0.000000e+00> : vector<16x384xf32>
    %10 = tpu.matmul %5, %9, %cst {dimension_numbers = #tpu.dot_dimension_numbers<[1], [0], [0], [1], [0, 0, 1, 1], [], []>} : vector<16x128xbf16>, vector<128x384xbf16>, vector<16x384xf32> -> vector<16x384xf32>
    %c0_9 = arith.constant 0 : index
    %c0_10 = arith.constant 0 : index
    %c0_11 = arith.constant 0 : index
    %11 = vector.load %arg5[%c0_9, %c0_10, %c0_11] : memref<1x1x384xf32, #tpu.memory_space<vmem>>, vector<1x1x384xf32>
    %12 = vector.shape_cast %11 : vector<1x1x384xf32> to vector<1x384xf32>
    %13 = vector.broadcast %12 : vector<1x384xf32> to vector<16x384xf32>
    %14 = arith.addf %10, %13 : vector<16x384xf32>
    %15 = vector.extract_strided_slice %14 {offsets = [0, 0], sizes = [16, 128], strides = [1, 1]} : vector<16x384xf32> to vector<16x128xf32>
    %16 = arith.truncf %15 : vector<16x128xf32> to vector<16x128xbf16>
    %17 = vector.extract_strided_slice %14 {offsets = [0, 128], sizes = [16, 128], strides = [1, 1]} : vector<16x384xf32> to vector<16x128xf32>
    %18 = arith.truncf %17 : vector<16x128xf32> to vector<16x128xbf16>
    %19 = vector.extract_strided_slice %14 {offsets = [0, 256], sizes = [16, 128], strides = [1, 1]} : vector<16x384xf32> to vector<16x128xf32>
    %20 = arith.truncf %19 : vector<16x128xf32> to vector<16x128xbf16>
    %21 = vector.extract_strided_slice %16 {offsets = [0, 0], sizes = [16, 32], strides = [1, 1]} : vector<16x128xbf16> to vector<16x32xbf16>
    %22 = vector.extract_strided_slice %18 {offsets = [0, 0], sizes = [16, 32], strides = [1, 1]} : vector<16x128xbf16> to vector<16x32xbf16>
    %23 = vector.extract_strided_slice %20 {offsets = [0, 0], sizes = [16, 32], strides = [1, 1]} : vector<16x128xbf16> to vector<16x32xbf16>
    %cst_12 = arith.constant dense<0.000000e+00> : vector<16x16xf32>
    %24 = tpu.matmul %21, %22, %cst_12 {dimension_numbers = #tpu.dot_dimension_numbers<[1], [1], [0], [0], [0, 0, 1, 0], [], []>} : vector<16x32xbf16>, vector<16x32xbf16>, vector<16x16xf32> -> vector<16x16xf32>
    %cst_13 = arith.constant 0.176776692 : f32
    %25 = vector.broadcast %cst_13 : f32 to vector<16x16xf32>
    %26 = arith.mulf %24, %25 : vector<16x16xf32>
    %27 = vector.broadcast %7 : vector<1x16xf32> to vector<16x16xf32>
    %28 = arith.addf %26, %27 : vector<16x16xf32>
    %cst_14 = arith.constant dense<0xFF800000> : vector<16xf32>
    %29 = vector.multi_reduction <maximumf>, %28, %cst_14 [1] : vector<16x16xf32> to vector<16xf32>
    %30 = vector.shape_cast %29 : vector<16xf32> to vector<16x1xf32>
    %31 = vector.broadcast %30 : vector<16x1xf32> to vector<16x16xf32>
    %32 = arith.subf %28, %31 : vector<16x16xf32>
    %33 = math.exp %32 : vector<16x16xf32>
    %cst_15 = arith.constant dense<0.000000e+00> : vector<16xf32>
    %34 = vector.multi_reduction <add>, %33, %cst_15 [1] : vector<16x16xf32> to vector<16xf32>
    %35 = vector.shape_cast %34 : vector<16xf32> to vector<16x1xf32>
    %36 = tpu.reciprocal %35 {approx = true} : vector<16x1xf32> -> vector<16x1xf32>
    %37 = vector.broadcast %36 : vector<16x1xf32> to vector<16x16xf32>
    %38 = arith.mulf %33, %37 : vector<16x16xf32>
    %39 = arith.truncf %38 : vector<16x16xf32> to vector<16x16xbf16>
    %cst_16 = arith.constant dense<0.000000e+00> : vector<16x32xf32>
    %40 = tpu.matmul %39, %23, %cst_16 {dimension_numbers = #tpu.dot_dimension_numbers<[1], [0], [0], [1], [0, 0, 1, 1], [], []>} : vector<16x16xbf16>, vector<16x32xbf16>, vector<16x32xf32> -> vector<16x32xf32>
    %41 = arith.truncf %40 : vector<16x32xf32> to vector<16x32xbf16>
    %c0_17 = arith.constant 0 : index
    %c0_18 = arith.constant 0 : index
    %42 = vector.load %arg19[%c0_17, %c0_18] : memref<16x128xbf16, #tpu.memory_space<vmem>>, vector<16x32xbf16>
    tpu.vector_store %arg19[%c0_17, %c0_18], %41 {strides = array<i32>} : memref<16x128xbf16, #tpu.memory_space<vmem>>, vector<16x32xbf16>,
    %43 = vector.extract_strided_slice %16 {offsets = [0, 32], sizes = [16, 32], strides = [1, 1]} : vector<16x128xbf16> to vector<16x32xbf16>
    %44 = vector.extract_strided_slice %18 {offsets = [0, 32], sizes = [16, 32], strides = [1, 1]} : vector<16x128xbf16> to vector<16x32xbf16>
    %45 = vector.extract_strided_slice %20 {offsets = [0, 32], sizes = [16, 32], strides = [1, 1]} : vector<16x128xbf16> to vector<16x32xbf16>
    %cst_19 = arith.constant dense<0.000000e+00> : vector<16x16xf32>
    %46 = tpu.matmul %43, %44, %cst_19 {dimension_numbers = #tpu.dot_dimension_numbers<[1], [1], [0], [0], [0, 0, 1, 0], [], []>} : vector<16x32xbf16>, vector<16x32xbf16>, vector<16x16xf32> -> vector<16x16xf32>
    %cst_20 = arith.constant 0.176776692 : f32
    %47 = vector.broadcast %cst_20 : f32 to vector<16x16xf32>
    %48 = arith.mulf %46, %47 : vector<16x16xf32>
    %49 = vector.broadcast %7 : vector<1x16xf32> to vector<16x16xf32>
    %50 = arith.addf %48, %49 : vector<16x16xf32>
    %cst_21 = arith.constant dense<0xFF800000> : vector<16xf32>
    %51 = vector.multi_reduction <maximumf>, %50, %cst_21 [1] : vector<16x16xf32> to vector<16xf32>
    %52 = vector.shape_cast %51 : vector<16xf32> to vector<16x1xf32>
    %53 = vector.broadcast %52 : vector<16x1xf32> to vector<16x16xf32>
    %54 = arith.subf %50, %53 : vector<16x16xf32>
    %55 = math.exp %54 : vector<16x16xf32>
    %cst_22 = arith.constant dense<0.000000e+00> : vector<16xf32>
    %56 = vector.multi_reduction <add>, %55, %cst_22 [1] : vector<16x16xf32> to vector<16xf32>
    %57 = vector.shape_cast %56 : vector<16xf32> to vector<16x1xf32>
    %58 = tpu.reciprocal %57 {approx = true} : vector<16x1xf32> -> vector<16x1xf32>
    %59 = vector.broadcast %58 : vector<16x1xf32> to vector<16x16xf32>
    %60 = arith.mulf %55, %59 : vector<16x16xf32>
    %61 = arith.truncf %60 : vector<16x16xf32> to vector<16x16xbf16>
    %cst_23 = arith.constant dense<0.000000e+00> : vector<16x32xf32>
    %62 = tpu.matmul %61, %45, %cst_23 {dimension_numbers = #tpu.dot_dimension_numbers<[1], [0], [0], [1], [0, 0, 1, 1], [], []>} : vector<16x16xbf16>, vector<16x32xbf16>, vector<16x32xf32> -> vector<16x32xf32>
    %63 = arith.truncf %62 : vector<16x32xf32> to vector<16x32xbf16>
    %c0_24 = arith.constant 0 : index
    %c32 = arith.constant 32 : index
    %64 = vector.load %arg19[%c0_24, %c32] : memref<16x128xbf16, #tpu.memory_space<vmem>>, vector<16x32xbf16>
    tpu.vector_store %arg19[%c0_24, %c32], %63 {strides = array<i32>} : memref<16x128xbf16, #tpu.memory_space<vmem>>, vector<16x32xbf16>,
    %65 = vector.extract_strided_slice %16 {offsets = [0, 64], sizes = [16, 32], strides = [1, 1]} : vector<16x128xbf16> to vector<16x32xbf16>
    %66 = vector.extract_strided_slice %18 {offsets = [0, 64], sizes = [16, 32], strides = [1, 1]} : vector<16x128xbf16> to vector<16x32xbf16>
    %67 = vector.extract_strided_slice %20 {offsets = [0, 64], sizes = [16, 32], strides = [1, 1]} : vector<16x128xbf16> to vector<16x32xbf16>
    %cst_25 = arith.constant dense<0.000000e+00> : vector<16x16xf32>
    %68 = tpu.matmul %65, %66, %cst_25 {dimension_numbers = #tpu.dot_dimension_numbers<[1], [1], [0], [0], [0, 0, 1, 0], [], []>} : vector<16x32xbf16>, vector<16x32xbf16>, vector<16x16xf32> -> vector<16x16xf32>
    %cst_26 = arith.constant 0.176776692 : f32
    %69 = vector.broadcast %cst_26 : f32 to vector<16x16xf32>
    %70 = arith.mulf %68, %69 : vector<16x16xf32>
    %71 = vector.broadcast %7 : vector<1x16xf32> to vector<16x16xf32>
    %72 = arith.addf %70, %71 : vector<16x16xf32>
    %cst_27 = arith.constant dense<0xFF800000> : vector<16xf32>
    %73 = vector.multi_reduction <maximumf>, %72, %cst_27 [1] : vector<16x16xf32> to vector<16xf32>
    %74 = vector.shape_cast %73 : vector<16xf32> to vector<16x1xf32>
    %75 = vector.broadcast %74 : vector<16x1xf32> to vector<16x16xf32>
    %76 = arith.subf %72, %75 : vector<16x16xf32>
    %77 = math.exp %76 : vector<16x16xf32>
    %cst_28 = arith.constant dense<0.000000e+00> : vector<16xf32>
    %78 = vector.multi_reduction <add>, %77, %cst_28 [1] : vector<16x16xf32> to vector<16xf32>
    %79 = vector.shape_cast %78 : vector<16xf32> to vector<16x1xf32>
    %80 = tpu.reciprocal %79 {approx = true} : vector<16x1xf32> -> vector<16x1xf32>
    %81 = vector.broadcast %80 : vector<16x1xf32> to vector<16x16xf32>
    %82 = arith.mulf %77, %81 : vector<16x16xf32>
    %83 = arith.truncf %82 : vector<16x16xf32> to vector<16x16xbf16>
    %cst_29 = arith.constant dense<0.000000e+00> : vector<16x32xf32>
    %84 = tpu.matmul %83, %67, %cst_29 {dimension_numbers = #tpu.dot_dimension_numbers<[1], [0], [0], [1], [0, 0, 1, 1], [], []>} : vector<16x16xbf16>, vector<16x32xbf16>, vector<16x32xf32> -> vector<16x32xf32>
    %85 = arith.truncf %84 : vector<16x32xf32> to vector<16x32xbf16>
    %c0_30 = arith.constant 0 : index
    %c64 = arith.constant 64 : index
    %86 = vector.load %arg19[%c0_30, %c64] : memref<16x128xbf16, #tpu.memory_space<vmem>>, vector<16x32xbf16>
    tpu.vector_store %arg19[%c0_30, %c64], %85 {strides = array<i32>} : memref<16x128xbf16, #tpu.memory_space<vmem>>, vector<16x32xbf16>,
    %87 = vector.extract_strided_slice %16 {offsets = [0, 96], sizes = [16, 32], strides = [1, 1]} : vector<16x128xbf16> to vector<16x32xbf16>
    %88 = vector.extract_strided_slice %18 {offsets = [0, 96], sizes = [16, 32], strides = [1, 1]} : vector<16x128xbf16> to vector<16x32xbf16>
    %89 = vector.extract_strided_slice %20 {offsets = [0, 96], sizes = [16, 32], strides = [1, 1]} : vector<16x128xbf16> to vector<16x32xbf16>
    %cst_31 = arith.constant dense<0.000000e+00> : vector<16x16xf32>
    %90 = tpu.matmul %87, %88, %cst_31 {dimension_numbers = #tpu.dot_dimension_numbers<[1], [1], [0], [0], [0, 0, 1, 0], [], []>} : vector<16x32xbf16>, vector<16x32xbf16>, vector<16x16xf32> -> vector<16x16xf32>
    %cst_32 = arith.constant 0.176776692 : f32
    %91 = vector.broadcast %cst_32 : f32 to vector<16x16xf32>
    %92 = arith.mulf %90, %91 : vector<16x16xf32>
    %93 = vector.broadcast %7 : vector<1x16xf32> to vector<16x16xf32>
    %94 = arith.addf %92, %93 : vector<16x16xf32>
    %cst_33 = arith.constant dense<0xFF800000> : vector<16xf32>
    %95 = vector.multi_reduction <maximumf>, %94, %cst_33 [1] : vector<16x16xf32> to vector<16xf32>
    %96 = vector.shape_cast %95 : vector<16xf32> to vector<16x1xf32>
    %97 = vector.broadcast %96 : vector<16x1xf32> to vector<16x16xf32>
    %98 = arith.subf %94, %97 : vector<16x16xf32>
    %99 = math.exp %98 : vector<16x16xf32>
    %cst_34 = arith.constant dense<0.000000e+00> : vector<16xf32>
    %100 = vector.multi_reduction <add>, %99, %cst_34 [1] : vector<16x16xf32> to vector<16xf32>
    %101 = vector.shape_cast %100 : vector<16xf32> to vector<16x1xf32>
    %102 = tpu.reciprocal %101 {approx = true} : vector<16x1xf32> -> vector<16x1xf32>
    %103 = vector.broadcast %102 : vector<16x1xf32> to vector<16x16xf32>
    %104 = arith.mulf %99, %103 : vector<16x16xf32>
    %105 = arith.truncf %104 : vector<16x16xf32> to vector<16x16xbf16>
    %cst_35 = arith.constant dense<0.000000e+00> : vector<16x32xf32>
    %106 = tpu.matmul %105, %89, %cst_35 {dimension_numbers = #tpu.dot_dimension_numbers<[1], [0], [0], [1], [0, 0, 1, 1], [], []>} : vector<16x16xbf16>, vector<16x32xbf16>, vector<16x32xf32> -> vector<16x32xf32>
    %107 = arith.truncf %106 : vector<16x32xf32> to vector<16x32xbf16>
    %c0_36 = arith.constant 0 : index
    %c96 = arith.constant 96 : index
    %108 = vector.load %arg19[%c0_36, %c96] : memref<16x128xbf16, #tpu.memory_space<vmem>>, vector<16x32xbf16>
    tpu.vector_store %arg19[%c0_36, %c96], %107 {strides = array<i32>} : memref<16x128xbf16, #tpu.memory_space<vmem>>, vector<16x32xbf16>,
    %c0_37 = arith.constant 0 : index
    %c0_38 = arith.constant 0 : index
    %109 = vector.load %arg19[%c0_37, %c0_38] : memref<16x128xbf16, #tpu.memory_space<vmem>>, vector<16x128xbf16>
    %c0_39 = arith.constant 0 : index
    %c0_40 = arith.constant 0 : index
    %c0_41 = arith.constant 0 : index
    %110 = vector.load %arg6[%c0_39, %c0_40, %c0_41] : memref<1x128x128xbf16, #tpu.memory_space<vmem>>, vector<1x128x128xbf16>
    %111 = vector.shape_cast %110 : vector<1x128x128xbf16> to vector<128x128xbf16>
    %cst_42 = arith.constant dense<0.000000e+00> : vector<16x128xf32>
    %112 = tpu.matmul %109, %111, %cst_42 {dimension_numbers = #tpu.dot_dimension_numbers<[1], [0], [0], [1], [0, 0, 1, 1], [], []>} : vector<16x128xbf16>, vector<128x128xbf16>, vector<16x128xf32> -> vector<16x128xf32>
    %c0_43 = arith.constant 0 : index
    %c0_44 = arith.constant 0 : index
    %c0_45 = arith.constant 0 : index
    %113 = vector.load %arg7[%c0_43, %c0_44, %c0_45] : memref<1x1x128xf32, #tpu.memory_space<vmem>>, vector<1x1x128xf32>
    %114 = vector.shape_cast %113 : vector<1x1x128xf32> to vector<1x128xf32>
    %115 = vector.broadcast %114 : vector<1x128xf32> to vector<16x128xf32>
    %116 = arith.addf %112, %115 : vector<16x128xf32>
    %117 = arith.addf %4, %116 : vector<16x128xf32>
    %c0_46 = arith.constant 0 : index
    %c0_47 = arith.constant 0 : index
    %c0_48 = arith.constant 0 : index
    %118 = vector.load %arg8[%c0_46, %c0_47, %c0_48] : memref<1x1x128xf32, #tpu.memory_space<vmem>>, vector<1x1x128xf32>
    %119 = vector.shape_cast %118 : vector<1x1x128xf32> to vector<1x128xf32>
    %c0_49 = arith.constant 0 : index
    %c0_50 = arith.constant 0 : index
    %c0_51 = arith.constant 0 : index
    %120 = vector.load %arg9[%c0_49, %c0_50, %c0_51] : memref<1x1x128xf32, #tpu.memory_space<vmem>>, vector<1x1x128xf32>
    %121 = vector.shape_cast %120 : vector<1x1x128xf32> to vector<1x128xf32>
    %cst_52 = arith.constant dense<0.000000e+00> : vector<16xf32>
    %122 = vector.multi_reduction <add>, %117, %cst_52 [1] : vector<16x128xf32> to vector<16xf32>
    %123 = vector.shape_cast %122 : vector<16xf32> to vector<16x1xf32>
    %cst_53 = arith.constant 1.280000e+02 : f32
    %124 = vector.broadcast %cst_53 : f32 to vector<16x1xf32>
    %125 = arith.divf %123, %124 : vector<16x1xf32>
    %126 = vector.broadcast %125 : vector<16x1xf32> to vector<16x128xf32>
    %127 = arith.subf %117, %126 : vector<16x128xf32>
    %128 = arith.mulf %127, %127 : vector<16x128xf32>
    %cst_54 = arith.constant dense<0.000000e+00> : vector<16xf32>
    %129 = vector.multi_reduction <add>, %128, %cst_54 [1] : vector<16x128xf32> to vector<16xf32>
    %130 = vector.shape_cast %129 : vector<16xf32> to vector<16x1xf32>
    %cst_55 = arith.constant 1.280000e+02 : f32
    %131 = vector.broadcast %cst_55 : f32 to vector<16x1xf32>
    %132 = arith.divf %130, %131 : vector<16x1xf32>
    %133 = vector.broadcast %125 : vector<16x1xf32> to vector<16x128xf32>
    %134 = arith.subf %117, %133 : vector<16x128xf32>
    %cst_56 = arith.constant 9.99999974E-6 : f32
    %135 = vector.broadcast %cst_56 : f32 to vector<16x1xf32>
    %136 = arith.addf %132, %135 : vector<16x1xf32>
    %137 = math.sqrt %136 : vector<16x1xf32>
    %138 = vector.broadcast %137 : vector<16x1xf32> to vector<16x128xf32>
    %139 = arith.divf %134, %138 : vector<16x128xf32>
    %140 = vector.broadcast %119 : vector<1x128xf32> to vector<16x128xf32>
    %141 = arith.mulf %139, %140 : vector<16x128xf32>
    %142 = vector.broadcast %121 : vector<1x128xf32> to vector<16x128xf32>
    %143 = arith.addf %141, %142 : vector<16x128xf32>
    %144 = arith.truncf %143 : vector<16x128xf32> to vector<16x128xbf16>
    %c0_57 = arith.constant 0 : index
    %c0_58 = arith.constant 0 : index
    %c0_59 = arith.constant 0 : index
    %145 = vector.load %arg10[%c0_57, %c0_58, %c0_59] : memref<1x128x512xbf16, #tpu.memory_space<vmem>>, vector<1x128x512xbf16>
    %146 = vector.shape_cast %145 : vector<1x128x512xbf16> to vector<128x512xbf16>
    %cst_60 = arith.constant dense<0.000000e+00> : vector<16x512xf32>
    %147 = tpu.matmul %144, %146, %cst_60 {dimension_numbers = #tpu.dot_dimension_numbers<[1], [0], [0], [1], [0, 0, 1, 1], [], []>} : vector<16x128xbf16>, vector<128x512xbf16>, vector<16x512xf32> -> vector<16x512xf32>
    %c0_61 = arith.constant 0 : index
    %c0_62 = arith.constant 0 : index
    %c0_63 = arith.constant 0 : index
    %148 = vector.load %arg11[%c0_61, %c0_62, %c0_63] : memref<1x1x512xf32, #tpu.memory_space<vmem>>, vector<1x1x512xf32>
    %149 = vector.shape_cast %148 : vector<1x1x512xf32> to vector<1x512xf32>
    %150 = vector.broadcast %149 : vector<1x512xf32> to vector<16x512xf32>
    %151 = arith.addf %147, %150 : vector<16x512xf32>
    %cst_64 = arith.constant 5.000000e-01 : f32
    %152 = vector.broadcast %cst_64 : f32 to vector<16x512xf32>
    %153 = arith.mulf %152, %151 : vector<16x512xf32>
    %cst_65 = arith.constant 0.707106769 : f32
    %154 = vector.broadcast %cst_65 : f32 to vector<16x512xf32>
    %155 = arith.mulf %151, %154 : vector<16x512xf32>
    %156 = math.erf %155 : vector<16x512xf32>
    %cst_66 = arith.constant 1.000000e+00 : f32
    %157 = vector.broadcast %cst_66 : f32 to vector<16x512xf32>
    %158 = arith.addf %157, %156 : vector<16x512xf32>
    %159 = arith.mulf %153, %158 : vector<16x512xf32>
    %160 = arith.truncf %159 : vector<16x512xf32> to vector<16x512xbf16>
    %c0_67 = arith.constant 0 : index
    %c0_68 = arith.constant 0 : index
    %c0_69 = arith.constant 0 : index
    %161 = vector.load %arg12[%c0_67, %c0_68, %c0_69] : memref<1x512x128xbf16, #tpu.memory_space<vmem>>, vector<1x512x128xbf16>
    %162 = vector.shape_cast %161 : vector<1x512x128xbf16> to vector<512x128xbf16>
    %cst_70 = arith.constant dense<0.000000e+00> : vector<16x128xf32>
    %163 = tpu.matmul %160, %162, %cst_70 {dimension_numbers = #tpu.dot_dimension_numbers<[1], [0], [0], [1], [0, 0, 1, 1], [], []>} : vector<16x512xbf16>, vector<512x128xbf16>, vector<16x128xf32> -> vector<16x128xf32>
    %c0_71 = arith.constant 0 : index
    %c0_72 = arith.constant 0 : index
    %c0_73 = arith.constant 0 : index
    %164 = vector.load %arg13[%c0_71, %c0_72, %c0_73] : memref<1x1x128xf32, #tpu.memory_space<vmem>>, vector<1x1x128xf32>
    %165 = vector.shape_cast %164 : vector<1x1x128xf32> to vector<1x128xf32>
    %166 = vector.broadcast %165 : vector<1x128xf32> to vector<16x128xf32>
    %167 = arith.addf %163, %166 : vector<16x128xf32>
    %168 = arith.addf %143, %167 : vector<16x128xf32>
    %c0_74 = arith.constant 0 : index
    %c0_75 = arith.constant 0 : index
    %c0_76 = arith.constant 0 : index
    %169 = vector.load %arg14[%c0_74, %c0_75, %c0_76] : memref<1x1x128xf32, #tpu.memory_space<vmem>>, vector<1x1x128xf32>
    %170 = vector.shape_cast %169 : vector<1x1x128xf32> to vector<1x128xf32>
    %c0_77 = arith.constant 0 : index
    %c0_78 = arith.constant 0 : index
    %c0_79 = arith.constant 0 : index
    %171 = vector.load %arg15[%c0_77, %c0_78, %c0_79] : memref<1x1x128xf32, #tpu.memory_space<vmem>>, vector<1x1x128xf32>
    %172 = vector.shape_cast %171 : vector<1x1x128xf32> to vector<1x128xf32>
    %cst_80 = arith.constant dense<0.000000e+00> : vector<16xf32>
    %173 = vector.multi_reduction <add>, %168, %cst_80 [1] : vector<16x128xf32> to vector<16xf32>
    %174 = vector.shape_cast %173 : vector<16xf32> to vector<16x1xf32>
    %cst_81 = arith.constant 1.280000e+02 : f32
    %175 = vector.broadcast %cst_81 : f32 to vector<16x1xf32>
    %176 = arith.divf %174, %175 : vector<16x1xf32>
    %177 = vector.broadcast %176 : vector<16x1xf32> to vector<16x128xf32>
    %178 = arith.subf %168, %177 : vector<16x128xf32>
    %179 = arith.mulf %178, %178 : vector<16x128xf32>
    %cst_82 = arith.constant dense<0.000000e+00> : vector<16xf32>
    %180 = vector.multi_reduction <add>, %179, %cst_82 [1] : vector<16x128xf32> to vector<16xf32>
    %181 = vector.shape_cast %180 : vector<16xf32> to vector<16x1xf32>
    %cst_83 = arith.constant 1.280000e+02 : f32
    %182 = vector.broadcast %cst_83 : f32 to vector<16x1xf32>
    %183 = arith.divf %181, %182 : vector<16x1xf32>
    %184 = vector.broadcast %176 : vector<16x1xf32> to vector<16x128xf32>
    %185 = arith.subf %168, %184 : vector<16x128xf32>
    %cst_84 = arith.constant 9.99999974E-6 : f32
    %186 = vector.broadcast %cst_84 : f32 to vector<16x1xf32>
    %187 = arith.addf %183, %186 : vector<16x1xf32>
    %188 = math.sqrt %187 : vector<16x1xf32>
    %189 = vector.broadcast %188 : vector<16x1xf32> to vector<16x128xf32>
    %190 = arith.divf %185, %189 : vector<16x128xf32>
    %191 = vector.broadcast %170 : vector<1x128xf32> to vector<16x128xf32>
    %192 = arith.mulf %190, %191 : vector<16x128xf32>
    %193 = vector.broadcast %172 : vector<1x128xf32> to vector<16x128xf32>
    %194 = arith.addf %192, %193 : vector<16x128xf32>
    %c0_85 = arith.constant 0 : index
    %c0_86 = arith.constant 0 : index
    %c0_87 = arith.constant 0 : index
    %195 = vector.load %arg18[%c0_85, %c0_86, %c0_87] : memref<1x16x128xf32, #tpu.memory_space<vmem>>, vector<1x16x128xf32>
    %196 = vector.shape_cast %195 : vector<1x16x128xf32> to vector<16x128xf32>
    %197 = vector.shape_cast %194 : vector<16x128xf32> to vector<1x16x128xf32>
    tpu.vector_store %arg18[%c0_85, %c0_86, %c0_87], %197 {strides = array<i32>} : memref<1x16x128xf32, #tpu.memory_space<vmem>>, vector<1x16x128xf32>,
    %c1_i32 = arith.constant 1 : i32
    %198 = arith.cmpi eq, %arg1, %c1_i32 : i32
    %199 = arith.extui %198 : i1 to i32
    %c0_i32_88 = arith.constant 0 : i32
    %200 = arith.cmpi ne, %199, %c0_i32_88 : i32
    scf.if %200 {
      %c0_89 = arith.constant 0 : index
      %c0_90 = arith.constant 0 : index
      %201 = vector.load %arg16[%c0_89, %c0_90] : memref<1x128xf32, #tpu.memory_space<vmem>>, vector<1x128xf32>
      %c0_91 = arith.constant 0 : index
      %c0_92 = arith.constant 0 : index
      %202 = vector.load %arg17[%c0_91, %c0_92] : memref<1x128xf32, #tpu.memory_space<vmem>>, vector<1x128xf32>
      %cst_93 = arith.constant dense<0.000000e+00> : vector<16xf32>
      %203 = vector.multi_reduction <add>, %194, %cst_93 [1] : vector<16x128xf32> to vector<16xf32>
      %204 = vector.shape_cast %203 : vector<16xf32> to vector<16x1xf32>
      %cst_94 = arith.constant 1.280000e+02 : f32
      %205 = vector.broadcast %cst_94 : f32 to vector<16x1xf32>
      %206 = arith.divf %204, %205 : vector<16x1xf32>
      %207 = vector.broadcast %206 : vector<16x1xf32> to vector<16x128xf32>
      %208 = arith.subf %194, %207 : vector<16x128xf32>
      %209 = arith.mulf %208, %208 : vector<16x128xf32>
      %cst_95 = arith.constant dense<0.000000e+00> : vector<16xf32>
      %210 = vector.multi_reduction <add>, %209, %cst_95 [1] : vector<16x128xf32> to vector<16xf32>
      %211 = vector.shape_cast %210 : vector<16xf32> to vector<16x1xf32>
      %cst_96 = arith.constant 1.280000e+02 : f32
      %212 = vector.broadcast %cst_96 : f32 to vector<16x1xf32>
      %213 = arith.divf %211, %212 : vector<16x1xf32>
      %214 = vector.broadcast %206 : vector<16x1xf32> to vector<16x128xf32>
      %215 = arith.subf %194, %214 : vector<16x128xf32>
      %cst_97 = arith.constant 9.99999974E-6 : f32
      %216 = vector.broadcast %cst_97 : f32 to vector<16x1xf32>
      %217 = arith.addf %213, %216 : vector<16x1xf32>
      %218 = math.sqrt %217 : vector<16x1xf32>
      %219 = vector.broadcast %218 : vector<16x1xf32> to vector<16x128xf32>
      %220 = arith.divf %215, %219 : vector<16x128xf32>
      %221 = vector.broadcast %201 : vector<1x128xf32> to vector<16x128xf32>
      %222 = arith.mulf %220, %221 : vector<16x128xf32>
      %223 = vector.broadcast %202 : vector<1x128xf32> to vector<16x128xf32>
      %224 = arith.addf %222, %223 : vector<16x128xf32>
      %c0_98 = arith.constant 0 : index
      %c0_99 = arith.constant 0 : index
      %c0_100 = arith.constant 0 : index
      %225 = vector.load %arg18[%c0_98, %c0_99, %c0_100] : memref<1x16x128xf32, #tpu.memory_space<vmem>>, vector<1x16x128xf32>
      %226 = vector.shape_cast %225 : vector<1x16x128xf32> to vector<16x128xf32>
      %227 = vector.shape_cast %224 : vector<16x128xf32> to vector<1x16x128xf32>
      tpu.vector_store %arg18[%c0_98, %c0_99, %c0_100], %227 {strides = array<i32>} : memref<1x16x128xf32, #tpu.memory_space<vmem>>, vector<1x16x128xf32>,
    } else {
    }
    return
  }
  func.func @transform_0(%arg0: i32, %arg1: i32) -> (i32, i32, i32) {
    %c0_i32 = arith.constant 0 : i32
    %c0_i32_0 = arith.constant 0 : i32
    %c0_i32_1 = arith.constant 0 : i32
    return %arg0, %c0_i32, %c0_i32_0 : i32, i32, i32
  }
  func.func @transform_1(%arg0: i32, %arg1: i32) -> (i32, i32, i32) {
    %c0_i32 = arith.constant 0 : i32
    %c0_i32_0 = arith.constant 0 : i32
    %c0_i32_1 = arith.constant 0 : i32
    return %arg0, %c0_i32, %c0_i32_0 : i32, i32, i32
  }
  func.func @transform_2(%arg0: i32, %arg1: i32) -> (i32, i32, i32) {
    %c0_i32 = arith.constant 0 : i32
    %c0_i32_0 = arith.constant 0 : i32
    %c0_i32_1 = arith.constant 0 : i32
    return %arg1, %c0_i32, %c0_i32_0 : i32, i32, i32
  }
  func.func @transform_3(%arg0: i32, %arg1: i32) -> (i32, i32, i32) {
    %c0_i32 = arith.constant 0 : i32
    %c0_i32_0 = arith.constant 0 : i32
    %c0_i32_1 = arith.constant 0 : i32
    return %arg1, %c0_i32, %c0_i32_0 : i32, i32, i32
  }
  func.func @transform_4(%arg0: i32, %arg1: i32) -> (i32, i32, i32) {
    %c0_i32 = arith.constant 0 : i32
    %c0_i32_0 = arith.constant 0 : i32
    %c0_i32_1 = arith.constant 0 : i32
    return %arg1, %c0_i32, %c0_i32_0 : i32, i32, i32
  }
  func.func @transform_5(%arg0: i32, %arg1: i32) -> (i32, i32, i32) {
    %c0_i32 = arith.constant 0 : i32
    %c0_i32_0 = arith.constant 0 : i32
    %c0_i32_1 = arith.constant 0 : i32
    return %arg1, %c0_i32, %c0_i32_0 : i32, i32, i32
  }
  func.func @transform_6(%arg0: i32, %arg1: i32) -> (i32, i32, i32) {
    %c0_i32 = arith.constant 0 : i32
    %c0_i32_0 = arith.constant 0 : i32
    %c0_i32_1 = arith.constant 0 : i32
    return %arg1, %c0_i32, %c0_i32_0 : i32, i32, i32
  }
  func.func @transform_7(%arg0: i32, %arg1: i32) -> (i32, i32, i32) {
    %c0_i32 = arith.constant 0 : i32
    %c0_i32_0 = arith.constant 0 : i32
    %c0_i32_1 = arith.constant 0 : i32
    return %arg1, %c0_i32, %c0_i32_0 : i32, i32, i32
  }
  func.func @transform_8(%arg0: i32, %arg1: i32) -> (i32, i32, i32) {
    %c0_i32 = arith.constant 0 : i32
    %c0_i32_0 = arith.constant 0 : i32
    %c0_i32_1 = arith.constant 0 : i32
    return %arg1, %c0_i32, %c0_i32_0 : i32, i32, i32
  }
  func.func @transform_9(%arg0: i32, %arg1: i32) -> (i32, i32, i32) {
    %c0_i32 = arith.constant 0 : i32
    %c0_i32_0 = arith.constant 0 : i32
    %c0_i32_1 = arith.constant 0 : i32
    return %arg1, %c0_i32, %c0_i32_0 : i32, i32, i32
  }
  func.func @transform_10(%arg0: i32, %arg1: i32) -> (i32, i32, i32) {
    %c0_i32 = arith.constant 0 : i32
    %c0_i32_0 = arith.constant 0 : i32
    %c0_i32_1 = arith.constant 0 : i32
    return %arg1, %c0_i32, %c0_i32_0 : i32, i32, i32
  }
  func.func @transform_11(%arg0: i32, %arg1: i32) -> (i32, i32, i32) {
    %c0_i32 = arith.constant 0 : i32
    %c0_i32_0 = arith.constant 0 : i32
    %c0_i32_1 = arith.constant 0 : i32
    return %arg1, %c0_i32, %c0_i32_0 : i32, i32, i32
  }
  func.func @transform_12(%arg0: i32, %arg1: i32) -> (i32, i32, i32) {
    %c0_i32 = arith.constant 0 : i32
    %c0_i32_0 = arith.constant 0 : i32
    %c0_i32_1 = arith.constant 0 : i32
    return %arg1, %c0_i32, %c0_i32_0 : i32, i32, i32
  }
  func.func @transform_13(%arg0: i32, %arg1: i32) -> (i32, i32, i32) {
    %c0_i32 = arith.constant 0 : i32
    %c0_i32_0 = arith.constant 0 : i32
    %c0_i32_1 = arith.constant 0 : i32
    return %arg1, %c0_i32, %c0_i32_0 : i32, i32, i32
  }
  func.func @transform_14(%arg0: i32, %arg1: i32) -> (i32, i32) {
    %c0_i32 = arith.constant 0 : i32
    %c0_i32_0 = arith.constant 0 : i32
    %c0_i32_1 = arith.constant 0 : i32
    return %c0_i32, %c0_i32_0 : i32, i32
  }
  func.func @transform_15(%arg0: i32, %arg1: i32) -> (i32, i32) {
    %c0_i32 = arith.constant 0 : i32
    %c0_i32_0 = arith.constant 0 : i32
    %c0_i32_1 = arith.constant 0 : i32
    return %c0_i32, %c0_i32_0 : i32, i32
  }
  func.func @transform_16(%arg0: i32, %arg1: i32) -> (i32, i32, i32) {
    %c0_i32 = arith.constant 0 : i32
    %c0_i32_0 = arith.constant 0 : i32
    %c0_i32_1 = arith.constant 0 : i32
    return %arg0, %c0_i32, %c0_i32_0 : i32, i32, i32
  }
}

</mosaic_0001>

<bundles_post_ra>
// kernel: tpu_custom_call.1
= control target key start
LH: loop header
LB: loop body
LE: loop exit
PB: predicated region body
PF: predicated region fallthrough
CT: control target
= control target key end

     0   :  { %s4821_s0 = inlined_call_operand.hbm [shape: f32[2,16,128], index: 0, kind: input, shape index: {}]   ;;  %s4822_s1 = inlined_call_operand.hbm [shape: f32[2,1,16], index: 1, kind: input, shape index: {}]   ;;  %s4823_s2 = inlined_call_operand.hbm [shape: bf16[2,128,384], index: 2, kind: input, shape index: {}]   ;;  %s4824_s3 = inlined_call_operand.hbm [shape: f32[2,1,384], index: 3, kind: input, shape index: {}]   ;;  %s4825_s4 = inlined_call_operand.hbm [shape: bf16[2,128,128], index: 4, kind: input, shape index: {}]   ;;  %s4826_s5 = inlined_call_operand.vmem [shape: f32[2,1,128], index: 5, kind: input, shape index: {}]   ;;  %s4827_s6 = inlined_call_operand.vmem [shape: f32[2,1,128], index: 6, kind: input, shape index: {}]   ;;  %s4828_s7 = inlined_call_operand.vmem [shape: f32[2,1,128], index: 7, kind: input, shape index: {}]   ;;  %s4829_s8 = inlined_call_operand.hbm [shape: bf16[2,128,512], index: 8, kind: input, shape index: {}]   ;;  %s4830_s9 = inlined_call_operand.vmem [shape: f32[2,1,512], index: 9, kind: input, shape index: {}]   ;;  %s4831_s10 = inlined_call_operand.hbm [shape: bf16[2,512,128], index: 10, kind: input, shape index: {}]   ;;  %s4832_s11 = inlined_call_operand.vmem [shape: f32[2,1,128], index: 11, kind: input, shape index: {}]   ;;  %s4833_s12 = inlined_call_operand.vmem [shape: f32[2,1,128], index: 12, kind: input, shape index: {}]   ;;  %s4834_s13 = inlined_call_operand.vmem [shape: f32[2,1,128], index: 13, kind: input, shape index: {}]   ;;  %s4835_s14 = inlined_call_operand.vmem [shape: f32[1,128], index: 14, kind: input, shape index: {}]   ;;  %s4836_s15 = inlined_call_operand.vmem [shape: f32[1,128], index: 15, kind: input, shape index: {}]   ;;  %s4837_s16 = inlined_call_operand.hbm [shape: f32[2,16,128], index: 16, kind: output, shape index: {}]  }
   0x1   :  { %4864 = sst [smem:[#allocation41_spill]] %s4821_s0 }
   0x2   :  { %4865 = sst [smem:[#allocation42_spill]] %s4822_s1 }
   0x3   :  { %4866 = sst [smem:[#allocation43_spill]] %s4823_s2 }
   0x4   :  { %4867 = sst [smem:[#allocation44_spill]] %s4824_s3 }
   0x5   :  { %4868 = sst [smem:[#allocation45_spill]] %s4825_s4 }
   0x6   :  { %4869 = sst [smem:[#allocation46_spill]] %s4826_s5 }
   0x7   :  { %4870 = sst [smem:[#allocation47_spill]] %s4827_s6 }
   0x8   :  { %4871 = sst [smem:[#allocation48_spill]] %s4828_s7 }
   0x9   :  { %4872 = sst [smem:[#allocation49_spill]] %s4829_s8 }
   0xa   :  { %4873 = sst [smem:[#allocation50_spill]] %s4830_s9 }
   0xb   :  { %4874 = sst [smem:[#allocation51_spill]] %s4831_s10 }
   0xc   :  { %4875 = sst [smem:[#allocation52_spill]] %s4832_s11 }
   0xd   :  { %4876 = sst [smem:[#allocation53_spill]] %s4833_s12 }
   0xe   :  { %4877 = sst [smem:[#allocation54_spill]] %s4834_s13 }
   0xf   :  { %4878 = sst [smem:[#allocation55_spill]] %s4835_s14 }
  0x10   :  { %4879 = sst [smem:[#allocation56_spill]] %s4836_s15 }
  0x11   :  { %4880 = sst [smem:[#allocation57_spill]] %s4837_s16 }
  0x12   :  { %21 = vsyncpa [#allocation4], 0 }
  0x13   :  { %23 = vsyncpa [#allocation4 + $0x1], 0 }
  0x14   :  { %24 = vsyncpa [#allocation7], 0 }
  0x15   :  { %26 = vsyncpa [#allocation7 + $0x1], 0 }
  0x16   :  { %27 = vsyncpa [#allocation10], 0 }
  0x17   :  { %29 = vsyncpa [#allocation10 + $0x1], 0 }
  0x18   :  { %30 = vsyncpa [#allocation13], 0 }
  0x19   :  { %32 = vsyncpa [#allocation13 + $0x1], 0 }
  0x1a   :  { %33 = vsyncpa [#allocation5], 0 }
  0x1b   :  { %35 = vsyncpa [#allocation5 + $0x1], 0  ;;  %s4112_s21 = smov 0   ;;  %s4114_s22 = smov 0  }
  0x1c   :  { %s4116_s23 = smov 0   ;;  %s4118_s24 = smov 0  }
  0x1d   :  { %s4120_s25 = smov 0   ;;  %s4122_s26 = smov 0  }
  0x1e   :  { %s4124_s27 = smov 0   ;;  %s4126_s28 = smov 0  }
  0x1f   :  { %s4128_s29 = smov 0   ;;  %s4130_s30 = smov 0  }
  0x20   :  { %s4132_s0 = smov 0  }
  0x21 LB: > { %4881 = sst [smem:[#allocation22_spill]] %s3965_s22  ;;  %s4166_s17 = sadd.s32 4294967295, %s4001_s0   ;;  %s4001_s0 = sphi %s4132_s0, %s41_s0   ;;  %s3997_s30 = sphi %s4130_s30, %s4971_s30   ;;  %s3993_s29 = sphi %s4128_s29, %s4973_s29   ;;  %s3989_s28 = sphi %s4126_s28, %s4969_s28   ;;  %s3985_s27 = sphi %s4124_s27, %s4972_s27   ;;  %s3981_s26 = sphi %s4122_s26, %s4968_s26   ;;  %s3977_s25 = sphi %s4120_s25, %s4967_s25   ;;  %s3973_s24 = sphi %s4118_s24, %s4966_s24   ;;  %s3969_s23 = sphi %s4116_s23, %s4965_s23   ;;  %s3965_s22 = sphi %s4114_s22, %s4964_s22   ;;  %s3961_s21 = sphi %s4112_s21, %s4963_s21  }
  0x22   : > { %4882 = sst [smem:[#allocation23_spill]] %s3969_s23  ;;  %s2989_s18 = sadd.s32 4294967294, %s4001_s0  }
  0x23   : > { %4883 = sst [smem:[#allocation24_spill]] %s3973_s24  ;;  %p67_p0 = scmp.ne.s32.totalorder %s3981_s26, %s3977_s25 }
  0x24   : > { %4884 = sst [smem:[#allocation25_spill]] %s3977_s25  ;;  %p68_p1 = scmp.eq.s32.totalorder %s4001_s0, 0 }
  0x25   : > { %4885 = sst [smem:[#allocation26_spill]] %s3981_s26  ;;  %p73_p2 = scmp.ne.s32.totalorder %s3977_s25, %s3973_s24 }
  0x26   : > { %4886 = sst [smem:[#allocation27_spill]] %s3985_s27  ;;  %p74_p3 = scmp.eq.s32.totalorder %s4166_s17, 0 }
  0x27   : > { %4887 = sst [smem:[#allocation28_spill]] %s3989_s28  ;;  %p4180_p4 = por %p68_p1, %p67_p0 }
  0x28   : > { %4888 = sst [smem:[#allocation29_spill]] %s3997_s30  ;;  %p4185_p5 = por %p74_p3, %p73_p2 }
  0x29   : > { %4889 = sst [smem:[#allocation30_spill]] %s4001_s0  ;;  %p119_p6 = scmp.ne.s32.totalorder %s3969_s23, %s3965_s22 }
  0x2a   : > { %4890 = sst [smem:[#allocation31_spill]] %s4166_s17  ;;  %p125_p7 = scmp.ne.s32.totalorder %s3965_s22, %s3961_s21 }
  0x2b   : > { %s4892_s15 = scalar_select %p4185_p5, 1, 0 }
  0x2c   : > { %p477_p8 = scmp.eq.s32.totalorder %s4166_s17, 3  ;;  %p4193_p9 = por %p119_p6, %p68_p1 }
  0x2d   : > { %4893 = sst [smem:[#allocation32_spill]] %s4892_s15  ;;  %p483_p10 = scmp.eq.s32.totalorder %s2989_s18, 3 }
  0x2e   : > { %p4197_p11 = por %p125_p7, %p74_p3  ;;  %p4204_p12 = por %p477_p8, %p67_p0 }
  0x2f   : > { %p4208_p13 = por %p483_p10, %p73_p2  ;;  %p3370_p5 = scmp.lt.s32.totalorder %s4001_s0, 4 }
  0x30   : > { %s4895_s19 = scalar_select %p4197_p11, 1, 0 }
  0x31   : > { %s4897_s28 = scalar_select %p4204_p12, 1, 0 }
  0x32   : > { %4896 = sst [smem:[#allocation33_spill]] %s4895_s19  ;;  %s4214_s21 = sand.u32 1, %s3981_s26  }
  0x33   : > { %4898 = sst [smem:[#allocation34_spill]] %s4897_s28  ;;  %s4218_s18 = sand.u32 1, %s4001_s0  }
  0x34   : > { %s4899_s24 = scalar_select %p4208_p13, 1, 0 }
  0x35   : > { %p4222_p1 = pnand %p3370_p5, %p4180_p4  ;;  %s2995_s28 = sshll.u32 %s3997_s30, 4 }
  0x36   : > { %4900 = sst [smem:[#allocation35_spill]] %s4899_s24  ;;  %s533_s9 = scalar_lea.vmem [#allocation6], %s4214_s21 }
  0x37   : > { %s4902_s1 = sld [smem:[#allocation42_spill]]  ;;  %s540_s7 = sshll.u32 %s533_s9, 4  ;;  %s541_s7 = int_to_ptr.vmem [resolvable:$true] %s540_s7 }
  0x38   : > { %p4233_p0 = pnand %p3370_p5, %p4193_p9  ;;  %s4844_s16 = scalar_lea.sflag [#allocation7], %s4218_s18 }
  0x39   : > { %p4852_p2 = pneg %p4222_p1  ;;  %s3682_s6 = scalar_lea.vmem %s541_s7, 16 }
  0x3a   : > { %p3683_p3 = scmp.ne.s32.totalorder %s541_s7, %s3682_s6  ;;  %s4003_s5 = smov [#allocation6]  }
  0x3b   : > { %s3687_s11 = sshll.u32 %s4003_s5, 4  ;;  %s3688_s11 = int_to_ptr.vmem [resolvable:$false] %s3687_s11 }
  0x3c   : > { %p3685_p4 = pnand %p3683_p3, %p4852_p2  ;;  %s3689_s12 = scalar_lea.vmem %s3688_s11, 32 }
  0x3d   : > { %s538_s24 = scalar_lea.hbm %s4902_s1, %s2995_s28  ;;  %p3690_p7 = scmp.lt.s32.totalorder %s541_s7, %s3688_s11 }
  0x3e   : > { %p3686_p6 = pneg %p3685_p4  ;;  %p3691_p8 = scmp.lt.s32.totalorder %s3689_s12, %s3682_s6 }
  0x40   : > { %p3692_p10 = por %p3691_p8, %p3690_p7 }
  0x42   : > { %p3693_p5 = pnand %p3692_p10, %p3686_p6 }
  0x44   : > { %3696 = shalt.err (!%p3693_p5)
}
  0x45   : > { %3350 = dma.hbm_to_vmem [thread:$0]  (!%p4222_p1), %s538_s24, 16, %s541_s7, %s4844_s16  }
  0x46   : > { %p3007_p9 = scmp.ge.s32.totalorder %s4001_s0, 1  ;;  %p691_p3 = scmp.lt.s32.totalorder %s4001_s0, 5 }
  0x47   : > { %s4250_s5 = sand.u32 1, %s3969_s23   ;;  %s50_s9 = sadd.s32 1, %s3993_s29 }
  0x48   : > { %p4252_p4 = pnand %p3007_p9, %p691_p3  ;;  %p51_p6 = scmp.ge.s32.totalorder %s50_s9, 2 }
  0x49   : > { %s3324_s20 = smul.u32 3, %s4250_s5  ;;  %s4907_s24 = sadd.s32 1, %s3997_s30 }
  0x4a   : > { %s4904_s6 = scalar_select %p4252_p4, 1, 0 }
  0x4b   : > { %s4975_s9 = smov (%p51_p6, %s50_s9), 0  ;;  %s4977_s24 = smov (!%p51_p6, %s4907_s24), %s3997_s30 }
  0x4c   : > { %4905 = sst [smem:[#allocation36_spill]] %s4904_s6  ;;  %s109_s11 = ssub.s32 %s3993_s29, %s4975_s9 }
  0x4d   : > { %4906 = sst [smem:[#allocation37_spill]] %s4975_s9  ;;  %p55_p7 = scmp.ge.s32.totalorder %s4977_s24, 2 }
  0x4e   : > { %p110_p8 = scmp.eq.s32.totalorder %s109_s11, 0  ;;  %s3325_s12 = smul.u32 48, %s3993_s29 }
  0x4f   : > { %s572_s16 = scalar_lea.vmem [#allocation9], %s3324_s20  ;;  %s4979_s24 = smov (%p55_p7, %s4977_s24), 0 }
  0x50   : > { %s580_s1 = sshll.u32 %s572_s16, 4  ;;  %4908 = sst [smem:[#allocation38_spill]] %s4979_s24  ;;  %s581_s1 = int_to_ptr.vmem [resolvable:$true] %s580_s1 }
  0x51   : > { %s4909_s0 = sadd.s32 1, %s3969_s23  ;;  %s57_s27 = ssub.s32 %s3997_s30, %s4979_s24 }
  0x52   : > { %s4273_s28 = scalar_select %p110_p8, %s3969_s23, %s4909_s0  }
  0x53   : > { %s4911_s3 = sld [smem:[#allocation44_spill]]  ;;  %p4280_p10 = scmp.eq.s32.totalorder %s57_s27, 0 }
  0x54   : > { %4910 = sst [smem:[#allocation39_spill]] %s4273_s28  ;;  %s4856_s11 = scalar_lea.sflag [#allocation10], %s4218_s18 }
  0x55   : > { %p4287_p5 = pneg %p4233_p0  ;;  %s3710_s20 = scalar_lea.vmem %s581_s1, 48 }
  0x56   : > { %p3711_p9 = scmp.ne.s32.totalorder %s581_s1, %s3710_s20  ;;  %s4004_s0 = smov [#allocation9]  }
  0x57   : > { %s3715_s19 = sshll.u32 %s4004_s0, 4  ;;  %s3716_s19 = int_to_ptr.vmem [resolvable:$false] %s3715_s19 }
  0x58   : > { %p3713_p3 = pnand %p3711_p9, %p4287_p5  ;;  %s3717_s27 = scalar_lea.vmem %s3716_s19, 96 }
  0x59   : > { %s578_s22 = scalar_lea.hbm %s4911_s3, %s3325_s12  ;;  %p3718_p7 = scmp.lt.s32.totalorder %s581_s1, %s3716_s19 }
  0x5a   : > { %p3714_p6 = pneg %p3713_p3  ;;  %p3719_p8 = scmp.lt.s32.totalorder %s3717_s27, %s3710_s20 }
  0x5c   : > { %p3720_p2 = por %p3719_p8, %p3718_p7 }
  0x5e   : > { %p3721_p13 = pnand %p3720_p2, %p3714_p6 }
  0x60   : > { %3724 = shalt.err (!%p3721_p13)
}
  0x61   : > { %3356 = dma.hbm_to_vmem [thread:$0]  (!%p4233_p0), %s578_s22, 48, %s581_s1, %s4856_s11  }
  0x62   : > { %s4914_s7 = sadd.s32 1, %s3981_s26  ;;  %s3145_s20 = sshll.u32 %s3993_s29, 12 }
  0x63   : > { %s4302_s12 = scalar_select %p4280_p10, %s3981_s26, %s4914_s7  }
  0x64   : > { %s4916_s8 = sld [smem:[#allocation49_spill]]  ;;  %s4917_s3 = sshll.u32 %s4250_s5, 8 }
  0x65   : > { %4915 = sst [smem:[#allocation40_spill]] %s4302_s12  ;;  %s630_s24 = scalar_lea.vmem [#allocation12], %s4917_s3 }
  0x66   : > { %s637_s9 = sshll.u32 %s630_s24, 4  ;;  %s627_s28 = scalar_lea.sflag [#allocation13], %s4218_s18  ;;  %s638_s9 = int_to_ptr.vmem [resolvable:$true] %s637_s9 }
  0x67   : > { %s3738_s23 = scalar_lea.vmem %s638_s9, 4096  ;;  %s4005_s1 = smov [#allocation12]  }
  0x68   : > { %p3739_p13 = scmp.ne.s32.totalorder %s638_s9, %s3738_s23  ;;  %s3743_s22 = sshll.u32 %s4005_s1, 4  ;;  %s3744_s22 = int_to_ptr.vmem [resolvable:$false] %s3743_s22 }
  0x69   : > { %s3745_s17 = scalar_lea.vmem %s3744_s22, 8192  ;;  %p3746_p10 = scmp.lt.s32.totalorder %s638_s9, %s3744_s22 }
  0x6a   : > { %s636_s27 = scalar_lea.hbm %s4916_s8, %s3145_s20  ;;  %p3741_p2 = pnand %p3739_p13, %p4287_p5 }
  0x6b   : > { %p3747_p3 = scmp.lt.s32.totalorder %s3745_s17, %s3738_s23 }
  0x6c   : > { %p3742_p9 = pneg %p3741_p2 }
  0x6d   : > { %p3748_p6 = por %p3747_p3, %p3746_p10 }
  0x6f   : > { %p3749_p7 = pnand %p3748_p6, %p3742_p9 }
  0x71   : > { %3752 = shalt.err (!%p3749_p7)
}
  0x72   : > { %s4006_s7 = smov 256   ;;  %s4007_s3 = smov 16  }
  0x73   : > { %3362 = dma.hbm_to_vmem [thread:$0]  (!%p4233_p0), %s636_s27, 4096, %s638_s9, %s627_s28, %s4006_s7, %s4006_s7, %s4007_s3  }
  0x74   : > { %s4918_s10 = sld [smem:[#allocation51_spill]]  ;;  %s4919_s23 = sshll.u32 %s4250_s5, 8 }
  0x75   : > { %s658_s1 = scalar_lea.vmem [#allocation14], %s4919_s23  ;;  %s3143_s17 = sshll.u32 %s3997_s30, 8 }
  0x76   : > { %s665_s22 = sshll.u32 %s658_s1, 4  ;;  %s4920_s11 = sshll.u32 %s4214_s21, 4  ;;  %s4324_s22 = int_to_ptr.vmem [resolvable:$true] %s665_s22 }
  0x77   : > { %s513_s8 = scalar_lea.vmem [#allocation3], %s4920_s11  ;;  %s4921_s25 = sld [smem:[#allocation41_spill]] }
  0x78   : > { %s520_s12 = sshll.u32 %s513_s8, 4  ;;  %s510_s9 = scalar_lea.sflag [#allocation4], %s4214_s21  ;;  %s521_s12 = int_to_ptr.vmem [resolvable:$true] %s520_s12 }
  0x79   : > { %s3766_s27 = scalar_lea.vmem %s521_s12, 256  ;;  %p4922_p13 = pneg %p4222_p1 }
  0x7a   : > { %s4320_s19 = scalar_lea.hbm %s4918_s10, %s3145_s20  ;;  %p3767_p8 = scmp.ne.s32.totalorder %s521_s12, %s3766_s27 }
  0x7b   : > { %s4008_s20 = smov [#allocation3]  }
  0x7c   : > { %p3769_p2 = pnand %p3767_p8, %p4922_p13  ;;  %s3771_s7 = sshll.u32 %s4008_s20, 4  ;;  %s3772_s7 = int_to_ptr.vmem [resolvable:$false] %s3771_s7 }
  0x7d   : > { %s519_s6 = scalar_lea.hbm %s4921_s25, %s3143_s17  ;;  %s3773_s3 = scalar_lea.vmem %s3772_s7, 512 }
  0x7e   : > { %p3770_p9 = pneg %p3769_p2  ;;  %p3774_p10 = scmp.lt.s32.totalorder %s521_s12, %s3772_s7 }
  0x7f   : > { %p3775_p3 = scmp.lt.s32.totalorder %s3773_s3, %s3766_s27 }
  0x81   : > { %p3776_p6 = por %p3775_p3, %p3774_p10 }
  0x83   : > { %p3777_p7 = pnand %p3776_p6, %p3770_p9 }
  0x85   : > { %3780 = shalt.err (!%p3777_p7)
}
  0x86   : > { %s4009_s8 = smov 128   ;;  %s4010_s15 = smov 8  }
  0x87   : > { %3347 = dma.hbm_to_vmem [thread:$0]  (!%p4222_p1), %s519_s6, 256, %s521_s12, %s510_s9, %s4009_s8, %s4009_s8, %s4010_s15  }
  0x88   : > { %s3323_s25 = smul.u32 3072, %s3993_s29  ;;  %s4924_s2 = sld [smem:[#allocation43_spill]] }
  0x89   : > { %s4923_s26 = smul.u32 192, %s4250_s5  ;;  %s2998_s1 = sshll.u32 %s4250_s5, 6 }
  0x8a   : > { %s4011_s27 = smov [#allocation8]  }
  0x8b   : > { %s551_s21 = scalar_lea.vmem [#allocation8], %s4923_s26  ;;  %s3799_s20 = sshll.u32 %s4011_s27, 4  ;;  %s3800_s20 = int_to_ptr.vmem [resolvable:$false] %s3799_s20 }
  0x8c   : > { %s558_s11 = sshll.u32 %s551_s21, 4  ;;  %s3801_s13 = scalar_lea.vmem %s3800_s20, 6144  ;;  %s559_s11 = int_to_ptr.vmem [resolvable:$true] %s558_s11 }
  0x8d   : > { %s3794_s17 = scalar_lea.vmem %s559_s11, 3072  ;;  %p3802_p1 = scmp.lt.s32.totalorder %s559_s11, %s3800_s20 }
  0x8e   : > { %s557_s23 = scalar_lea.hbm %s4924_s2, %s3323_s25  ;;  %p3795_p8 = scmp.ne.s32.totalorder %s559_s11, %s3794_s17 }
  0x8f   : > { %p3803_p9 = scmp.lt.s32.totalorder %s3801_s13, %s3794_s17 }
  0x90   : > { %p3797_p13 = pnand %p3795_p8, %p4287_p5 }
  0x91   : > { %p3804_p10 = por %p3803_p9, %p3802_p1 }
  0x92   : > { %p3798_p2 = pneg %p3797_p13 }
  0x94   : > { %p3805_p3 = pnand %p3804_p10, %p3798_p2 }
  0x96   : > { %3808 = shalt.err (!%p3805_p3)
}
  0x97   : > { %s4012_s6 = smov 192   ;;  %s4013_s5 = smov 12  }
  0x98   : > { %s4925_s12 = scalar_lea.sflag [#allocation7], %s4218_s18  ;;  %s3144_s9 = sshll.u32 %s3993_s29, 10 }
  0x99   : > { %3353 = dma.hbm_to_vmem [thread:$0]  (!%p4233_p0), %s557_s23, 3072, %s559_s11, %s4925_s12, %s4012_s6, %s4012_s6, %s4013_s5  }
  0x9a   : > { %s4926_s4 = sld [smem:[#allocation45_spill]]  ;;  %s591_s15 = scalar_lea.vmem [#allocation11], %s2998_s1 }
  0x9b   : > { %s598_s25 = sshll.u32 %s591_s15, 4  ;;  %s4014_s21 = smov [#allocation11]   ;;  %s599_s25 = int_to_ptr.vmem [resolvable:$true] %s598_s25 }
  0x9c   : > { %s3822_s26 = scalar_lea.vmem %s599_s25, 1024  ;;  %s3827_s24 = sshll.u32 %s4014_s21, 4  ;;  %s3828_s24 = int_to_ptr.vmem [resolvable:$false] %s3827_s24 }
  0x9d   : > { %p3823_p6 = scmp.ne.s32.totalorder %s599_s25, %s3822_s26  ;;  %s3829_s0 = scalar_lea.vmem %s3828_s24, 2048 }
  0x9e   : > { %p3830_p13 = scmp.lt.s32.totalorder %s599_s25, %s3828_s24  ;;  %p3831_p2 = scmp.lt.s32.totalorder %s3829_s0, %s3822_s26 }
  0x9f   : > { %p3825_p7 = pnand %p3823_p6, %p4287_p5 }
  0xa0   : > { %s597_s8 = scalar_lea.hbm %s4926_s4, %s3144_s9  ;;  %p3832_p1 = por %p3831_p2, %p3830_p13 }
  0xa1   : > { %p3826_p8 = pneg %p3825_p7 }
  0xa3   : > { %p3833_p9 = pnand %p3832_p1, %p3826_p8 }
  0xa5   : > { %3836 = shalt.err (!%p3833_p9)
}
  0xa6   : > { %s4015_s11 = smov 64   ;;  %s4016_s23 = smov 4  }
  0xa7   : > { %s4927_s1 = scalar_lea.sflag [#allocation10], %s4218_s18  ;;  %s3850_s17 = scalar_lea.vmem %s4324_s22, 4096 }
  0xa8   : > { %3359 = dma.hbm_to_vmem [thread:$0]  (!%p4233_p0), %s597_s8, 1024, %s599_s25, %s4927_s1, %s4015_s11, %s4015_s11, %s4016_s23  }
  0xa9   : > { %p3851_p10 = scmp.ne.s32.totalorder %s4324_s22, %s3850_s17  ;;  %s4017_s27 = smov [#allocation14]  }
  0xaa   : > { %s3855_s20 = sshll.u32 %s4017_s27, 4  ;;  %s3856_s20 = int_to_ptr.vmem [resolvable:$false] %s3855_s20 }
  0xab   : > { %p3853_p3 = pnand %p3851_p10, %p4287_p5  ;;  %s3857_s13 = scalar_lea.vmem %s3856_s20, 8192 }
  0xac   : > { %p3858_p7 = scmp.lt.s32.totalorder %s4324_s22, %s3856_s20  ;;  %p3859_p8 = scmp.lt.s32.totalorder %s3857_s13, %s3850_s17 }
  0xad   : > { %p3854_p6 = pneg %p3853_p3 }
  0xae   : > { %p3860_p13 = por %p3859_p8, %p3858_p7 }
  0xb0   : > { %p3861_p2 = pnand %p3860_p13, %p3854_p6 }
  0xb2   : > { %3864 = shalt.err (!%p3861_p2)
}
  0xb3   : > { %3365 = dma.hbm_to_vmem [thread:$0]  (!%p4233_p0), %s4320_s19, 4096, %s4324_s22, %s627_s28, %s4015_s11, %s4015_s11, %s4016_s23  }
  0xb4   : > { %695 = sbr.rel (%p4252_p4) target bundleno = 3506 (0xdb2), region = 84  ;;  %s4929_s16 = sld [smem:[#allocation25_spill]] (!%p4252_p4) }
  0xb5   : > { %s4930_s5 = sld [smem:[#allocation32_spill]] (!%p4252_p4) }
  0xba   : > { %s4375_s12 = sand.u32 1, %s4929_s16  }
  0xbb   : > { %s4862_s9 = sshll.u32 %s4375_s12, 4  ;;  %s698_s7 = scalar_lea.sflag [#allocation4], %s4375_s12 }
  0xbc   : > { %s4381_s3 = scalar_lea.vmem [#allocation3], %s4862_s9  ;;  %p4931_p5 = scmp.ne.s32.totalorder %s4930_s5, 0 }
  0xbe   : > { %3936 = dma.done.wait (%p4931_p5), %s698_s7, 256  }
  0xbf   : > { %3938 = vsyncadd (%p4931_p5), %s698_s7, 4294967040  ;;  %s4932_s14 = sld [smem:[#allocation31_spill]] }
  0xc5   : > { %s706_s18 = sand.u32 1, %s4932_s14  }
  0xc6   : > { %s707_s28 = scalar_lea.sflag [#allocation7], %s706_s18 }
  0xc7   : > { %3940 = dma.done.wait (%p4931_p5), %s707_s28, 16  }
  0xc8   : > { %3942 = vsyncadd (%p4931_p5), %s707_s28, 4294967280  ;;  %s4933_s22 = sld [smem:[#allocation22_spill]] }
  0xce   : > { %s716_s15 = sand.u32 1, %s4933_s22  }
  0xcf   : > { %s3326_s25 = smul.u32 192, %s716_s15 }
  0xd1   : > { %s4394_s26 = scalar_lea.vmem [#allocation8], %s3326_s25 }
  0xd2   : > { %3944 = dma.done.wait (%p4197_p11), %s707_s28, 3072  }
  0xd3   : > { %3946 = vsyncadd (%p4197_p11), %s707_s28, 4294964224  ;;  %s3327_s21 = smul.u32 3, %s716_s15  ;;  %s724_s24 = scalar_lea.sflag [#allocation10], %s706_s18 }
  0xd5   : > { %s4400_s0 = scalar_lea.vmem [#allocation9], %s3327_s21 }
  0xd6   : > { %3948 = dma.done.wait (%p4197_p11), %s724_s24, 1072  }
  0xd7   : > { %3950 = vsyncadd (%p4197_p11), %s724_s24, 4294966224  ;;  %s3009_s11 = sshll.u32 %s716_s15, 6  ;;  %s3010_s23 = sshll.u32 %s716_s15, 8 }
  0xd8   : > { %s4406_s1 = scalar_lea.vmem [#allocation11], %s3009_s11  ;;  %s742_s17 = scalar_lea.sflag [#allocation13], %s706_s18 }
  0xd9   : > { %s4408_s27 = scalar_lea.vmem [#allocation12], %s3010_s23 }
  0xda   : > { %3952 = dma.done.wait (%p4197_p11), %s742_s17, 8192  }
  0xdb   : > { %3954 = vsyncadd (%p4197_p11), %s742_s17, 4294959104  ;;  %s4935_s20 = sld [smem:[#allocation27_spill]]  ;;  %s4448_s8 = scalar_lea.vmem [#allocation14], %s3010_s23 }
  0xdc   : > { %s4938_s25 = sld [smem:[#allocation48_spill]]  ;;  %s4943_s15 = sshll.u32 %s4375_s12, 4 }
  0xdd   : > { %s4939_s19 = sld [smem:[#allocation50_spill]] }
  0xde   : > { %s4940_s2 = sld [smem:[#allocation52_spill]] }
  0xdf   : > { %s4941_s7 = sld [smem:[#allocation53_spill]] }
  0xe0   : > { %s4942_s28 = sld [smem:[#allocation54_spill]] }
  0xe1   : > { %p854_p0 = scmp.lt.s32.totalorder %s4935_s20, 1  ;;  %p3014_p11 = scmp.ne.s32.totalorder %s4935_s20, 0 }
  0xe3   : > { %s4416_s13 = scalar_select %p854_p0, %s4935_s20, 1 }
  0xe4   : > { %880 = sbr.rel (%p3014_p11) target bundleno = 235 (0xeb), region = 116 }
  0xe5   : > { %s862_s21 = scalar_lea.vmem %s4938_s25, %s4416_s13  ;;  %s3013_s24 = sshll.u32 %s4416_s13, 2 }
  0xe6   : > { %s4434_s6 = scalar_lea.vmem %s4939_s19, %s3013_s24  ;;  %s869_s4 = scalar_lea.vmem %s4940_s2, %s4416_s13 }
  0xe7   : > { %s872_s30 = scalar_lea.vmem %s4941_s7, %s4416_s13  ;;  %s875_s22 = scalar_lea.vmem %s4942_s28, %s4416_s13 }
  0xe8   : > { %s4452_s25 = scalar_lea.vmem [#allocation15], %s4943_s15 }
  0xe9   : > { %v881_v0 = vld [vmem:[%s4381_s3] sm:$0xff]  ;;  %v882_v1 = vld [vmem:[%s4381_s3 + $0x8] sm:$0xff] }
  0xea   : > { %883 = vst [vmem:[%s4452_s25] sm:$0xff] %v881_v0  ;;  %884 = vst [vmem:[%s4452_s25 + $0x8] sm:$0xff] %v882_v1 }
  0xeb PF: > { %v3476_v2 = vld [vmem:[%s4394_s26 + $0xac] ss:$12 sps:$4 sm:$0xff]   ;;  %v3478_v3 = vld [vmem:[%s4394_s26 + $0xa8] ss:$12 sps:$4 sm:$0xff]   ;;  %v4018_v4 = vmov 0   ;;  %v4019_v5 = vmov 0.0   ;;  %v923_v31 = vlaneseq }
  0xec   : > { %1098 = vmatprep.mubr.bf16.mxu0 %v4018_v4  ;;  %3234 = vmatprep.subr.bf16.mxu1 %v4019_v5  ;;  %v3479_v6 = vld [vmem:[%s4394_s26 + $0x94] ss:$12 sps:$4 sm:$0xff]   ;;  %v3481_v7 = vld [vmem:[%s4394_s26 + $0x90] ss:$12 sps:$4 sm:$0xff]   ;;  %v3484_v9 = vld [vmem:[%s4394_s26 + $0x78] ss:$12 sps:$4 sm:$0xff]  }
  0xed   : > { %1066 = vmatprep.subr.bf16.mxu0 %v3476_v2  ;;  %v3482_v8 = vld [vmem:[%s4394_s26 + $0x7c] ss:$12 sps:$4 sm:$0xff]   ;;  %v3485_v10 = vld [vmem:[%s4394_s26 + $0x64] ss:$12 sps:$4 sm:$0xff]   ;;  %v3487_v11 = vld [vmem:[%s4394_s26 + $0x60] ss:$12 sps:$4 sm:$0xff]  }
  0xee   : > { %1067 = vmatpush1.bf16.msra.mxu0 %v3478_v3  ;;  %v3488_v12 = vld [vmem:[%s4394_s26 + $0x4c] ss:$12 sps:$4 sm:$0xff]   ;;  %v3500_v13 = vld [vmem:[%s4394_s26 + $0xb0] ss:$12 sps:$4 sm:$0xff]   ;;  %v3490_v15 = vld [vmem:[%s4394_s26 + $0x48] ss:$12 sps:$4 sm:$0xff]  }
  0xef   : > { %1068 = vmatprep.subr.bf16.mxu0 %v3479_v6  ;;  %3235 = vmatpush3.bf16.msra.mxu1 %v3500_v13  ;;  %v3501_v14 = vld [vmem:[%s4394_s26 + $0x98] ss:$12 sps:$4 sm:$0xff]   ;;  %v3491_v16 = vld [vmem:[%s4394_s26 + $0x34] ss:$12 sps:$4 sm:$0xff]   ;;  %v3493_v17 = vld [vmem:[%s4394_s26 + $0x30] ss:$12 sps:$4 sm:$0xff]  }
  0xf0   : > { %3236 = vmatprep.subr.bf16.mxu1 %v4019_v5  ;;  %v3494_v18 = vld [vmem:[%s4394_s26 + $0x1c] ss:$12 sps:$4 sm:$0xff]   ;;  %v3502_v19 = vld [vmem:[%s4394_s26 + $0x80] ss:$12 sps:$4 sm:$0xff]   ;;  %v3496_v21 = vld [vmem:[%s4394_s26 + $0x18] ss:$12 sps:$4 sm:$0xff]  }
  0xf1   : > { %v3503_v20 = vld [vmem:[%s4394_s26 + $0x68] ss:$12 sps:$4 sm:$0xff]   ;;  %v3497_v22 = vld [vmem:[%s4394_s26 + $0x4] ss:$12 sps:$4 sm:$0xff]   ;;  %v3499_v24 = vld [vmem:[%s4394_s26] ss:$12 sps:$4 sm:$0xff]  }
  0xf2   : > { %1069 = vmatpush1.bf16.msra.mxu0 %v3481_v7  ;;  %v3504_v23 = vld [vmem:[%s4394_s26 + $0x50] ss:$12 sps:$4 sm:$0xff]   ;;  %v3505_v27 = vld [vmem:[%s4394_s26 + $0x38] ss:$12 sps:$4 sm:$0xff]   ;;  %v3506_v29 = vld [vmem:[%s4394_s26 + $0x20] ss:$12 sps:$4 sm:$0xff]  }
  0xf3   : > { %1070 = vmatprep.subr.bf16.mxu0 %v3482_v8  ;;  %3237 = vmatpush3.bf16.msra.mxu1 %v3501_v14  ;;  %v4486_v25 = vld [vmem:[%s4452_s25] sm:$0xff]  ;;  %v4489_v26 = vld [vmem:[%s4452_s25 + $0x8] sm:$0xff]  ;;  %vm4020_vm0 = vmmov 0   ;;  %v4508_v32 = vshrl.u32 %v923_v31, 7  ;;  %vm1153_vm1 = vcmask 261120   ;;  %s4944_s2 = scalar_lea.vmem [#allocation6], %s4375_s12 }
  0xf4   : > { %3238 = vmatprep.subr.bf16.mxu1 %v4019_v5  ;;  %v887_v28 = vpack.c.bf16 %v4489_v26, %v4486_v25  ;;  %v3507_v30 = vld [vmem:[%s4394_s26 + $0x8] ss:$12 sps:$4 sm:$0xff]   ;;  %3250 = vmatprep.mubr.msk.bf16.mxu1 %vm4020_vm0, %v4019_v5  ;;  %v921_v35 = vld [vmem:[%s4400_s0] sm:$0x7]  ;;  %vm1211_vm2 = vcmask 130048   ;;  %s4021_s10 = smov 96  }
  0xf5   : > { %v929_v33 = vsub.s32 1, %v4508_v32  ;;  %v925_v40 = vsub.s32 0, %v4508_v32  ;;  %v933_v49 = vsub.s32 2, %v4508_v32  ;;  %v4531_v59 = vld [vmem:[%s4944_s2] ss:$0 sm:$0xff]  ;;  %s4022_s9 = smov 32  }
  0xf6   : > { %1071 = vmatpush1.bf16.msra.mxu0 %v3484_v9  ;;  %s4023_s3 = smov 64   ;;  %vm1287_vm3 = vcmask 257024   ;;  %vm1430_vm4 = vcmask 519424   ;;  %vm1570_vm5 = vcmask 781824   ;;  %vm1710_vm6 = vcmask 1044224   ;;  %s4945_s0 = sld [smem:[#allocation46_spill]] }
  0xf7   : > { %1072 = vmatprep.subr.bf16.mxu0 %v3485_v10  ;;  %3239 = vmatpush3.bf16.msra.mxu1 %v3502_v19  ;;  %v930_v37 = vrot.slane %v921_v35, %v929_v33  ;;  %v926_v44 = vrot.slane %v921_v35, %v925_v40  ;;  %v934_v50 = vrot.slane %v921_v35, %v933_v49  ;;  %s4947_s20 = sld [smem:[#allocation47_spill]] }
  0xf8   : > { %3240 = vmatprep.subr.bf16.mxu1 %v4019_v5  ;;  %s4953_s15 = sld [smem:[#allocation27_spill]] }
  0xfa   : > { %1073 = vmatpush1.bf16.msra.mxu0 %v3487_v11 }
  0xfb   : > { %1074 = vmatprep.subr.bf16.mxu0 %v3488_v12  ;;  %3241 = vmatpush3.bf16.msra.mxu1 %v3503_v20 }
  0xfc   : > { %3242 = vmatprep.subr.bf16.mxu1 %v4019_v5  ;;  %s4946_s23 = scalar_lea.vmem %s4945_s0, %s4416_s13 }
  0xfd   : > { %s4948_s7 = scalar_lea.vmem %s4947_s20, %s4416_s13 }
  0xfe   : > { %1075 = vmatpush1.bf16.msra.mxu0 %v3490_v15  ;;  %p3135_p4 = scmp.ne.s32.totalorder %s4953_s15, 1 }
  0xff   : > { %1076 = vmatprep.subr.bf16.mxu0 %v3491_v16  ;;  %3243 = vmatpush3.bf16.msra.mxu1 %v3504_v23 }
 0x100   : > { %3244 = vmatprep.subr.bf16.mxu1 %v4019_v5 }
 0x102   : > { %1077 = vmatpush1.bf16.msra.mxu0 %v3493_v17 }
 0x103   : > { %1078 = vmatprep.subr.bf16.mxu0 %v3494_v18  ;;  %3245 = vmatpush3.bf16.msra.mxu1 %v3505_v27 }
 0x104   : > { %3246 = vmatprep.subr.bf16.mxu1 %v4019_v5 }
 0x106   : > { %1079 = vmatpush1.bf16.msra.mxu0 %v3496_v21 }
 0x107   : > { %1080 = vmatprep.subr.bf16.mxu0 %v3497_v22  ;;  %3247 = vmatpush3.bf16.msra.mxu1 %v3506_v29 }
 0x108   : > { %3248 = vmatprep.subr.bf16.mxu1 %v4019_v5 }
 0x10a   : > { %1081 = vmatpush1.bf16.msra.mxu0 %v3499_v24 }
 0x10b   : > { %3278 = vmatprep.subr.bf16.mxu0 %v4019_v5  ;;  %3249 = vmatpush3.bf16.msra.mxu1 %v3507_v30 }
 0x10c   : > { %3254 = vmatprep.subr.bf16.mxu1 %v4019_v5 }
 0x10d   : > { %1099 = vmatmul.mubr.bf16.vlgmr.msra.gmra.mxu0 %v887_v28 }
 0x10e   : > { %3280 = vmatprep.mubr.msk.bf16.mxu0 %vm4020_vm0, %v4019_v5  ;;  %3251 = vmatmul.mubr.bf16.vlgmr.msra.gmra.mxu1 %v887_v28 }
 0x10f   : > { %3256 = vmatprep.mubr.msk.bf16.mxu1 %vm4020_vm0, %v4019_v5 }
 0x1cd   : > { %v1100_v34 = vpop.f32.mrf.mxu0 }
 0x1ce   : > { %v1101_v47 = vadd.f32 %v1100_v34, %v926_v44  ;;  %v1143_v51 = vpop.f32.mrf.mxu1 }
 0x1cf   : > { %v1102_v36 = vpop.f32.mrf.mxu0  ;;  %v1144_v53 = vadd.f32 %v1143_v51, %v934_v50 }
 0x1d0   : > { %v1103_v41 = vadd.f32 %v1102_v36, %v930_v37  ;;  %v3252_v52 = vpop.f32.mrf.mxu1 }
 0x1d1   : > { %v1104_v38 = vpop.f32.mrf.mxu0 }
 0x1d2   : > { %v1105_v46 = vadd.f32 %v1104_v38, %v926_v44  ;;  %v1146_v54 = vpop.f32.mrf.mxu1 }
 0x1d3   : > { %v1106_v39 = vpop.f32.mrf.mxu0  ;;  %v1147_v55 = vadd.f32 %v1146_v54, %v934_v50 }
 0x1d4   : > { %v1107_v42 = vadd.f32 %v1106_v39, %v930_v37  ;;  %v1150_v48 = vpack.c.bf16 %v1105_v46, %v1101_v47  ;;  %v3253_v56 = vpop.f32.mrf.mxu1 }
 0x1d5   : > { %v4525_v57 = vpack.c.bf16 %v1147_v55, %v1144_v53 }
 0x1d6   : > { %v1151_v43 = vpack.c.bf16 %v1107_v42, %v1103_v41 }
 0x1d8   : > { %v1158_v45 = vsel %vm1153_vm1, %v1151_v43, 0 }
 0x1d9   : > { %3255 = vmatpush3.bf16.xpose.msra.mxu1 %v1158_v45 }
 0x1da   : > { %3260 = vmatprep.subr.bf16.mxu1 %v4019_v5 }
 0x1e0   : > { %3257 = vmatmul.mubr.msk.bf16.vlgmr.msra.gmra.mxu1 %vm1153_vm1, %v1150_v48 }
 0x1e1   : > { %3262 = vmatprep.mubr.msk.bf16.mxu1 %vm4020_vm0, %v4019_v5  ;;  %3261 = vmatpush3.bf16.msra.mxu1 %v4525_v57 }
 0x1e2   : > { %3266 = vmatprep.subr.bf16.mxu1 %v4019_v5 }
 0x2a0   : > { %v1194_v58 = vpop.f32.mrf.mxu1 }
 0x2a1   : > { %v1201_v60 = vmul.f32 0.17677669, %v1194_v58 }
 0x2a2   : > { %v3258_v61 = vpop.f32.mrf.mxu1 }
 0x2a3   : > { %v1209_v62 = vadd.f32 %v4531_v59, %v1201_v60 }
 0x2a4   : > { %v1197_v63 = vpop.f32.mrf.mxu1 }
 0x2a5   : > { %v1202_v0 = vmul.f32 0.17677669, %v1197_v63  ;;  %v1212_v1 = vsel %vm1211_vm2, %v1209_v62, -inf }
 0x2a6   : > { %1213 = vmax.xlane.f32.xlu0 %v1212_v1  ;;  %v3259_v2 = vpop.f32.mrf.mxu1 }
 0x2a7   : > { %v1210_v3 = vadd.f32 %v4531_v59, %v1202_v0 }
 0x2a9   : > { %v1215_v6 = vsel %vm1211_vm2, %v1210_v3, -inf }
 0x2aa   : > { %1216 = vmax.xlane.f32.xlu0 %v1215_v6 }
 0x2c0   : > { %1294 = vrot.lane.b32.xlu0 %v1151_v43, %s4021_s10 }
 0x2c4   : > { %1575 = vrot.lane.b32.xlu0 %v1151_v43, %s4022_s9 }
 0x32f   : > { %v1214_v7 = vpop.xlane.xlu0 %1213 }
 0x330   : > { %v1218_v8 = vsub.f32 %v1209_v62, %v1214_v7 }
 0x332   : > { %v1220_v9 = vmul.f32 1.442695, %v1218_v8 }
 0x333   : > { %v1217_v10 = vpop.xlane.xlu0 %1216 }
 0x334   : > { %3597 = vpow2.f32 %v1220_v9  ;;  %v1219_v11 = vsub.f32 %v1210_v3, %v1217_v10 }
 0x336   : > { %v1222_v12 = vmul.f32 1.442695, %v1219_v11 }
 0x337   : > { %v1295_v20 = vpop.permute.xlu0 %1294 }
 0x338   : > { %3599 = vpow2.f32 %v1222_v12  ;;  %v1300_v35 = vsel %vm1153_vm1, %v1295_v20, 0 }
 0x33b   : > { %v1576_v27 = vpop.permute.xlu0 %1575 }
 0x33c   : > { %v1581_v31 = vsel %vm1153_vm1, %v1576_v27, 0 }
 0x341   : > { %v3598_v13 = vpop.eup %3597 }
 0x342   : > { %v1224_v14 = vsel %vm1211_vm2, %v3598_v13, 0.0 }
 0x343   : > { %1225 = vadd.xlane.f32.xlu1 %v1224_v14 }
 0x345   : > { %v3600_v15 = vpop.eup %3599 }
 0x346   : > { %v1227_v16 = vsel %vm1211_vm2, %v3600_v15, 0.0 }
 0x347   : > { %1228 = vadd.xlane.f32.xlu1 %v1227_v16 }
 0x358   : > { %1291 = vrot.lane.b32.xlu1 %v1150_v48, %s4021_s10 }
 0x35c   : > { %1435 = vrot.lane.b32.xlu1 %v1151_v43, %s4023_s3 }
 0x360   : > { %1433 = vrot.lane.b32.xlu1 %v1150_v48, %s4023_s3 }
 0x364   : > { %1573 = vrot.lane.b32.xlu1 %v1150_v48, %s4022_s9 }
 0x3cc   : > { %v1226_v17 = vpop.xlane.xlu1 %1225 }
 0x3cd   : > { %3601 = vrcp.f32 %v1226_v17 }
 0x3d0   : > { %v1229_v18 = vpop.xlane.xlu1 %1228 }
 0x3d1   : > { %3603 = vrcp.f32 %v1229_v18 }
 0x3d4   : > { %v1292_v19 = vpop.permute.xlu1 %1291 }
 0x3d8   : > { %v1436_v21 = vpop.permute.xlu1 %1435 }
 0x3d9   : > { %v1441_v22 = vsel %vm1153_vm1, %v1436_v21, 0 }
 0x3da   : > { %3279 = vmatpush3.bf16.xpose.msra.mxu0 %v1441_v22  ;;  %v3602_v23 = vpop.eup %3601 }
 0x3db   : > { %3290 = vmatprep.subr.bf16.mxu0 %v4019_v5  ;;  %v1232_v28 = vmul.f32 %v3602_v23, %v3598_v13 }
 0x3dc   : > { %v1434_v30 = vpop.permute.xlu1 %1433 }
 0x3de   : > { %v3604_v24 = vpop.eup %3603 }
 0x3df   : > { %v1233_v29 = vmul.f32 %v3604_v24, %v3600_v15 }
 0x3e0   : > { %v1574_v36 = vpop.permute.xlu1 %1573 }
 0x3e1   : > { %3281 = vmatmul.mubr.msk.bf16.vlgmr.msra.gmra.mxu0 %vm1153_vm1, %v1434_v30  ;;  %v1234_v34 = vpack.c.bf16 %v1233_v29, %v1232_v28 }
 0x3e2   : > { %3291 = vmatpush3.bf16.xpose.msra.mxu0 %v1581_v31  ;;  %3292 = vmatprep.mubr.msk.bf16.mxu0 %vm4020_vm0, %v4019_v5 }
 0x3e3   : > { %3263 = vmatmul.mubr.msk.bf16.vlgmr.msra.gmra.mxu1 %vm1211_vm2, %v1234_v34  ;;  %3302 = vmatprep.subr.bf16.mxu0 %v4019_v5 }
 0x3e4   : > { %3267 = vmatpush3.bf16.xpose.msra.mxu1 %v1300_v35  ;;  %3268 = vmatprep.mubr.msk.bf16.mxu1 %vm4020_vm0, %v4019_v5 }
 0x3e5   : > { %3272 = vmatprep.subr.bf16.mxu1 %v4019_v5 }
 0x3e9   : > { %3293 = vmatmul.mubr.msk.bf16.vlgmr.msra.gmra.mxu0 %vm1153_vm1, %v1574_v36 }
 0x3ea   : > { %3318 = vmatprep.mubr.msk.bf16.mxu0 %vm4020_vm0, %v4019_v5 }
 0x3eb   : > { %3269 = vmatmul.mubr.msk.bf16.vlgmr.msra.gmra.mxu1 %vm1153_vm1, %v1292_v19 }
 0x3ec   : > { %3274 = vmatprep.mubr.msk.bf16.mxu1 %vm4020_vm0, %v4019_v5 }
 0x4a1   : > { %v1477_v37 = vpop.f32.mrf.mxu0 }
 0x4a2   : > { %v1484_v50 = vmul.f32 0.17677669, %v1477_v37 }
 0x4a3   : > { %v1272_v38 = vpop.f32.mrf.mxu1  ;;  %v3282_v39 = vpop.f32.mrf.mxu0 }
 0x4a4   : > { %v3147_v41 = vpack.c.bf16 %v1272_v38, %v1272_v38  ;;  %v1486_v62 = vadd.f32 %v4531_v59, %v1484_v50 }
 0x4a5   : > { %v3264_v42 = vpop.f32.mrf.mxu1  ;;  %v1480_v43 = vpop.f32.mrf.mxu0 }
 0x4a6   : > { %1288 = vst.msk [vmem:[#allocation2] sm:$0xf] %vm1287_vm3, %v3147_v41  ;;  %v1485_v58 = vmul.f32 0.17677669, %v1480_v43  ;;  %v1488_v6 = vsel %vm1211_vm2, %v1486_v62, -inf }
 0x4a7   : > { %v1275_v44 = vpop.f32.mrf.mxu1  ;;  %v3283_v45 = vpop.f32.mrf.mxu0 }
 0x4a8   : > { %v3148_v46 = vpack.c.bf16 %v1275_v44, %v1275_v44  ;;  %v1487_v9 = vadd.f32 %v4531_v59, %v1485_v58 }
 0x4a9   : > { %v3265_v47 = vpop.f32.mrf.mxu1  ;;  %v1617_v48 = vpop.f32.mrf.mxu0 }
 0x4aa   : > { %1289 = vst.msk [vmem:[#allocation2 + $0x4] sm:$0xf] %vm1287_vm3, %v3148_v46  ;;  %v1624_v7 = vmul.f32 0.17677669, %v1617_v48  ;;  %v1491_v11 = vsel %vm1211_vm2, %v1487_v9, -inf }
 0x4ab   : > { %v1336_v51 = vpop.f32.mrf.mxu1  ;;  %v3294_v52 = vpop.f32.mrf.mxu0 }
 0x4ac   : > { %v1343_v53 = vmul.f32 0.17677669, %v1336_v51  ;;  %v1626_v13 = vadd.f32 %v4531_v59, %v1624_v7 }
 0x4ad   : > { %v3270_v54 = vpop.f32.mrf.mxu1  ;;  %v1620_v55 = vpop.f32.mrf.mxu0 }
 0x4ae   : > { %v1345_v56 = vadd.f32 %v4531_v59, %v1343_v53  ;;  %v1625_v63 = vmul.f32 0.17677669, %v1620_v55  ;;  %v1628_v14 = vsel %vm1211_vm2, %v1626_v13, -inf }
 0x4af   : > { %v1339_v60 = vpop.f32.mrf.mxu1  ;;  %v3295_v61 = vpop.f32.mrf.mxu0 }
 0x4b0   : > { %v1344_v0 = vmul.f32 0.17677669, %v1339_v60  ;;  %v1347_v1 = vsel %vm1211_vm2, %v1345_v56, -inf  ;;  %v1627_v10 = vadd.f32 %v4531_v59, %v1625_v63 }
 0x4b1   : > { %1348 = vmax.xlane.f32.xlu0 %v1347_v1  ;;  %v3271_v2 = vpop.f32.mrf.mxu1 }
 0x4b2   : > { %v1346_v3 = vadd.f32 %v4531_v59, %v1344_v0  ;;  %v1631_v12 = vsel %vm1211_vm2, %v1627_v10, -inf }
 0x4b4   : > { %v1350_v8 = vsel %vm1211_vm2, %v1346_v3, -inf }
 0x4b5   : > { %1489 = vmax.xlane.f32.xlu0 %v1488_v6  ;;  %1351 = vmax.xlane.f32.xlu1 %v1350_v8 }
 0x4b9   : > { %1492 = vmax.xlane.f32.xlu0 %v1491_v11  ;;  %1632 = vmax.xlane.f32.xlu1 %v1631_v12 }
 0x4bd   : > { %1629 = vmax.xlane.f32.xlu0 %v1628_v14  ;;  %v3509_v14 = vld [vmem:[%s4406_s1 + $0x30] sm:$0xff]  }
 0x53a   : > { %v1349_v15 = vpop.xlane.xlu0 %1348 }
 0x53b   : > { %v1353_v24 = vsub.f32 %v1345_v56, %v1349_v15  ;;  %v3510_v15 = vld [vmem:[%s4406_s1 + $0x28] sm:$0xff]  }
 0x53d   : > { %v1355_v31 = vmul.f32 1.442695, %v1353_v24  ;;  %v3513_v24 = vld [vmem:[%s4406_s1 + $0x10] sm:$0xff]  }
 0x53e   : > { %v1490_v16 = vpop.xlane.xlu0 %1489  ;;  %v1352_v17 = vpop.xlane.xlu1 %1351 }
 0x53f   : > { %v1494_v18 = vsub.f32 %v1486_v62, %v1490_v16  ;;  %v1354_v27 = vsub.f32 %v1346_v3, %v1352_v17  ;;  %v3511_v16 = vld [vmem:[%s4406_s1 + $0x20] sm:$0xff]  }
 0x541   : > { %v1496_v19 = vmul.f32 1.442695, %v1494_v18  ;;  %v1357_v34 = vmul.f32 1.442695, %v1354_v27 }
 0x542   : > { %v1493_v20 = vpop.xlane.xlu0 %1492  ;;  %v1633_v21 = vpop.xlane.xlu1 %1632 }
 0x543   : > { %3605 = vpow2.f32 %v1496_v19  ;;  %v1495_v22 = vsub.f32 %v1487_v9, %v1493_v20  ;;  %v1635_v23 = vsub.f32 %v1627_v10, %v1633_v21  ;;  %v3512_v20 = vld [vmem:[%s4406_s1 + $0x18] sm:$0xff]  }
 0x545   : > { %v1498_v28 = vmul.f32 1.442695, %v1495_v22  ;;  %v1638_v29 = vmul.f32 1.442695, %v1635_v23 }
 0x546   : > { %v1630_v59 = vpop.xlane.xlu0 %1629 }
 0x547   : > { %3607 = vpow2.f32 %v1498_v28  ;;  %v1634_v30 = vsub.f32 %v1626_v13, %v1630_v59  ;;  %v3508_v13 = vld [vmem:[%s4406_s1 + $0x38] sm:$0xff]   ;;  %v3514_v59 = vld [vmem:[%s4406_s1 + $0x8] sm:$0xff]  }
 0x548   : > { %3609 = vpow2.f32 %v1638_v29  ;;  %3303 = vmatpush3.bf16.msra.mxu0 %v3508_v13  ;;  %v3529_v13 = vld [vmem:[%s4408_s27 + $0xa0] ss:$16 sps:$4 sm:$0xff]  }
 0x549   : > { %v1636_v35 = vmul.f32 1.442695, %v1634_v30  ;;  %3304 = vmatprep.subr.bf16.mxu0 %v4019_v5 }
 0x54b   : > { %3611 = vpow2.f32 %v1636_v35 }
 0x54c   : > { %3613 = vpow2.f32 %v1355_v31  ;;  %3305 = vmatpush3.bf16.msra.mxu0 %v3509_v14  ;;  %v3515_v31 = vld [vmem:[%s4406_s1] sm:$0xff]   ;;  %v3532_v14 = vld [vmem:[%s4408_s27 + $0xa8] ss:$16 sps:$4 sm:$0xff]  }
 0x54d   : > { %3615 = vpow2.f32 %v1357_v34  ;;  %3306 = vmatprep.subr.bf16.mxu0 %v4019_v5 }
 0x550   : > { %v3606_v36 = vpop.eup %3605  ;;  %3307 = vmatpush3.bf16.msra.mxu0 %v3510_v15  ;;  %v3535_v15 = vld [vmem:[%s4408_s27 + $0x80] ss:$16 sps:$4 sm:$0xff]  }
 0x551   : > { %v1500_v37 = vsel %vm1211_vm2, %v3606_v36, 0.0  ;;  %3308 = vmatprep.subr.bf16.mxu0 %v4019_v5 }
 0x552   : > { %1501 = vadd.xlane.f32.xlu0 %v1500_v37 }
 0x554   : > { %v3608_v38 = vpop.eup %3607  ;;  %3309 = vmatpush3.bf16.msra.mxu0 %v3511_v16  ;;  %v3537_v16 = vld [vmem:[%s4408_s27 + $0x84] ss:$16 sps:$4 sm:$0xff]  }
 0x555   : > { %v1503_v39 = vsel %vm1211_vm2, %v3608_v38, 0.0  ;;  %v3610_v41 = vpop.eup %3609  ;;  %3310 = vmatprep.subr.bf16.mxu0 %v4019_v5 }
 0x556   : > { %1504 = vadd.xlane.f32.xlu1 %v1503_v39  ;;  %v1643_v45 = vsel %vm1211_vm2, %v3610_v41, 0.0 }
 0x558   : > { %v3612_v42 = vpop.eup %3611  ;;  %3311 = vmatpush3.bf16.msra.mxu0 %v3512_v20  ;;  %v3546_v20 = vld [vmem:[%s4408_s27 + $0x6c] ss:$16 sps:$4 sm:$0xff]  }
 0x559   : > { %v3614_v43 = vpop.eup %3613  ;;  %v1640_v44 = vsel %vm1211_vm2, %v3612_v42, 0.0  ;;  %3312 = vmatprep.subr.bf16.mxu0 %v4019_v5 }
 0x55a   : > { %v3616_v46 = vpop.eup %3615  ;;  %1641 = vadd.xlane.f32.xlu0 %v1640_v44  ;;  %1644 = vadd.xlane.f32.xlu1 %v1643_v45  ;;  %v1359_v47 = vsel %vm1211_vm2, %v3614_v43, 0.0 }
 0x55b   : > { %v1362_v48 = vsel %vm1211_vm2, %v3616_v46, 0.0 }
 0x55c   : > { %3313 = vmatpush3.bf16.msra.mxu0 %v3513_v24  ;;  %v3552_v24 = vld [vmem:[%s4408_s27 + $0x4c] ss:$16 sps:$4 sm:$0xff]  }
 0x55d   : > { %3314 = vmatprep.subr.bf16.mxu0 %v4019_v5 }
 0x55e   : > { %1360 = vadd.xlane.f32.xlu0 %v1359_v47  ;;  %1363 = vadd.xlane.f32.xlu1 %v1362_v48 }
 0x560   : > { %3315 = vmatpush3.bf16.msra.mxu0 %v3514_v59  ;;  %v3558_v59 = vld [vmem:[%s4408_s27 + $0x2c] ss:$16 sps:$4 sm:$0xff]  }
 0x561   : > { %3316 = vmatprep.subr.bf16.mxu0 %v4019_v5 }
 0x564   : > { %3317 = vmatpush3.bf16.msra.mxu0 %v3515_v31  ;;  %v3556_v31 = vld [vmem:[%s4408_s27 + $0x28] ss:$16 sps:$4 sm:$0xff]  }
 0x56f   : > { %1511 = vrot.lane.b32.xlu1 %v4525_v57, %s4023_s3 }
 0x573   : > { %1651 = vrot.lane.b32.xlu1 %v4525_v57, %s4022_s9 }
 0x574   : > { %1371 = vrot.lane.b32.xlu0 %v4525_v57, %s4021_s10 }
 0x5db   : > { %v1502_v50 = vpop.xlane.xlu0 %1501 }
 0x5df   : > { %v1505_v51 = vpop.xlane.xlu1 %1504 }
 0x5e3   : > { %v1642_v52 = vpop.xlane.xlu0 %1641  ;;  %v1645_v53 = vpop.xlane.xlu1 %1644 }
 0x5e7   : > { %v1361_v54 = vpop.xlane.xlu0 %1360  ;;  %v1364_v55 = vpop.xlane.xlu1 %1363 }
 0x5e8   : > { %3617 = vrcp.f32 %v1361_v54 }
 0x5e9   : > { %3619 = vrcp.f32 %v1364_v55 }
 0x5ea   : > { %3621 = vrcp.f32 %v1505_v51 }
 0x5eb   : > { %v1372_v56 = vpop.permute.xlu0 %1371  ;;  %3623 = vrcp.f32 %v1502_v50  ;;  %v1512_v0 = vpop.permute.xlu1 %1511  ;;  %v3056_v50 = vld [vmem:[%s4946_s23] ss:$0 sm:$0xff] }
 0x5ec   : > { %3273 = vmatpush3.bf16.msra.mxu1 %v1372_v56  ;;  %3625 = vrcp.f32 %v1642_v52 }
 0x5ed   : > { %3284 = vmatprep.subr.bf16.mxu1 %v4019_v5  ;;  %3627 = vrcp.f32 %v1645_v53 }
 0x5ef   : > { %v1652_v9 = vpop.permute.xlu1 %1651 }
 0x5f5   : > { %v3618_v58 = vpop.eup %3617 }
 0x5f6   : > { %v3620_v60 = vpop.eup %3619  ;;  %v1367_v61 = vmul.f32 %v3618_v58, %v3614_v43 }
 0x5f7   : > { %v1368_v57 = vmul.f32 %v3620_v60, %v3616_v46  ;;  %v3622_v63 = vpop.eup %3621 }
 0x5f8   : > { %v3624_v1 = vpop.eup %3623  ;;  %v1509_v2 = vmul.f32 %v3622_v63, %v3608_v38 }
 0x5f9   : > { %v1369_v62 = vpack.c.bf16 %v1368_v57, %v1367_v61  ;;  %v1508_v3 = vmul.f32 %v3624_v1, %v3606_v36  ;;  %v3626_v6 = vpop.eup %3625  ;;  %v3519_v1 = vld [vmem:[%s4408_s27 + $0xe4] ss:$16 sps:$4 sm:$0xff]  }
 0x5fa   : > { %v3628_v8 = vpop.eup %3627  ;;  %v1648_v10 = vmul.f32 %v3626_v6, %v3612_v42  ;;  %v3520_v6 = vld [vmem:[%s4408_s27 + $0xe8] ss:$16 sps:$4 sm:$0xff]  }
 0x5fb   : > { %3275 = vmatmul.mubr.msk.bf16.vlgmr.msra.gmra.mxu1 %vm1211_vm2, %v1369_v62  ;;  %v1510_v7 = vpack.c.bf16 %v1509_v2, %v1508_v3  ;;  %v1649_v11 = vmul.f32 %v3628_v8, %v3610_v41  ;;  %v3522_v2 = vld [vmem:[%s4408_s27 + $0xec] ss:$16 sps:$4 sm:$0xff]   ;;  %v3517_v3 = vld [vmem:[%s4408_s27 + $0xe0] ss:$16 sps:$4 sm:$0xff]  }
 0x5fc   : > { %3285 = vmatpush3.bf16.msra.mxu1 %v1512_v0  ;;  %3286 = vmatprep.mubr.msk.bf16.mxu1 %vm4020_vm0, %v4019_v5  ;;  %v3528_v8 = vld [vmem:[%s4408_s27 + $0xcc] ss:$16 sps:$4 sm:$0xff]  }
 0x5fd   : > { %3296 = vmatprep.subr.bf16.mxu1 %v4019_v5  ;;  %v1650_v12 = vpack.c.bf16 %v1649_v11, %v1648_v10  ;;  %2148 = vmatprep.subr.bf16.mxu0 %v3522_v2  ;;  %v3526_v10 = vld [vmem:[%s4408_s27 + $0xc8] ss:$16 sps:$4 sm:$0xff]   ;;  %v3531_v11 = vld [vmem:[%s4408_s27 + $0xa4] ss:$16 sps:$4 sm:$0xff]  }
 0x5fe   : > { %v3567_v2 = vld [vmem:[%s4448_s8 + $0x38] sm:$0xff]  }
 0x603   : > { %3287 = vmatmul.mubr.msk.bf16.vlgmr.msra.gmra.mxu1 %vm1211_vm2, %v1510_v7  ;;  %v3525_v7 = vld [vmem:[%s4408_s27 + $0xc4] ss:$16 sps:$4 sm:$0xff]  }
 0x604   : > { %3297 = vmatpush3.bf16.msra.mxu1 %v1652_v9  ;;  %3298 = vmatprep.mubr.msk.bf16.mxu1 %vm4020_vm0, %v4019_v5  ;;  %v3523_v9 = vld [vmem:[%s4408_s27 + $0xc0] ss:$16 sps:$4 sm:$0xff]  }
 0x605   : > { %2105 = vmatprep.subr.bf16.mxu1 %v3519_v1  ;;  %v3566_v1 = vld [vmem:[%s4448_s8 + $0xf8] sm:$0xff]  }
 0x60b   : > { %3299 = vmatmul.mubr.msk.bf16.vlgmr.msra.gmra.mxu1 %vm1211_vm2, %v1650_v12  ;;  %v3534_v12 = vld [vmem:[%s4408_s27 + $0xac] ss:$16 sps:$4 sm:$0xff]  }
 0x60c   : > { %2137 = vmatprep.mubr.bf16.mxu1 %v4018_v4  ;;  %2106 = vmatpush1.bf16.msra.mxu1 %v3517_v3  ;;  %v3568_v3 = vld [vmem:[%s4448_s8 + $0xb8] sm:$0xff]  }
 0x60d   : > { %2107 = vmatprep.subr.bf16.mxu1 %v3525_v7  ;;  %v3570_v7 = vld [vmem:[%s4448_s8 + $0xf0] sm:$0xff]  }
 0x610   : > { %2108 = vmatpush1.bf16.msra.mxu1 %v3523_v9  ;;  %v3572_v9 = vld [vmem:[%s4448_s8 + $0xb0] sm:$0xff]  }
 0x611   : > { %2109 = vmatprep.subr.bf16.mxu1 %v3531_v11  ;;  %v3574_v11 = vld [vmem:[%s4448_s8 + $0xe8] sm:$0xff]  }
 0x614   : > { %2110 = vmatpush1.bf16.msra.mxu1 %v3529_v13  ;;  %v3576_v13 = vld [vmem:[%s4448_s8 + $0xa8] sm:$0xff]  }
 0x615   : > { %2111 = vmatprep.subr.bf16.mxu1 %v3537_v16  ;;  %v3579_v16 = vld [vmem:[%s4448_s8 + $0x20] sm:$0xff]  }
 0x618   : > { %2112 = vmatpush1.bf16.msra.mxu1 %v3535_v15  ;;  %v3578_v15 = vld [vmem:[%s4448_s8 + $0xe0] sm:$0xff]  }
 0x6bb   : > { %v1411_v17 = vpop.f32.mrf.mxu1 }
 0x6bc   : > { %v3149_v18 = vpack.c.bf16 %v1411_v17, %v1411_v17  ;;  %v3538_v17 = vld [vmem:[%s4408_s27 + $0x88] ss:$16 sps:$4 sm:$0xff]  }
 0x6bd   : > { %v3276_v19 = vpop.f32.mrf.mxu1 }
 0x6be   : > { %1424 = vrot.lane.b32.xlu1 %v3149_v18, %s4022_s9  ;;  %v3540_v18 = vld [vmem:[%s4408_s27 + $0x8c] ss:$16 sps:$4 sm:$0xff]   ;;  %v3543_v19 = vld [vmem:[%s4408_s27 + $0x64] ss:$16 sps:$4 sm:$0xff]  }
 0x6bf   : > { %v1414_v21 = vpop.f32.mrf.mxu1  ;;  %2113 = vmatprep.subr.bf16.mxu1 %v3543_v19  ;;  %v3582_v19 = vld [vmem:[%s4448_s8 + $0xd8] sm:$0xff]  }
 0x6c0   : > { %v3150_v22 = vpack.c.bf16 %v1414_v21, %v1414_v21  ;;  %v3541_v21 = vld [vmem:[%s4408_s27 + $0x60] ss:$16 sps:$4 sm:$0xff]  }
 0x6c1   : > { %v3277_v23 = vpop.f32.mrf.mxu1  ;;  %2114 = vmatpush1.bf16.msra.mxu1 %v3541_v21  ;;  %v3584_v21 = vld [vmem:[%s4448_s8 + $0x98] sm:$0xff]  }
 0x6c2   : > { %1426 = vrot.lane.b32.xlu0 %v3150_v22, %s4022_s9  ;;  %v3544_v22 = vld [vmem:[%s4408_s27 + $0x68] ss:$16 sps:$4 sm:$0xff]   ;;  %v3549_v23 = vld [vmem:[%s4408_s27 + $0x44] ss:$16 sps:$4 sm:$0xff]   ;;  %s4955_s9 = sld [smem:[#allocation56_spill]] (!%p3135_p4) }
 0x6c3   : > { %v1551_v27 = vpop.f32.mrf.mxu1  ;;  %2115 = vmatprep.subr.bf16.mxu1 %v3549_v23  ;;  %v3586_v23 = vld [vmem:[%s4448_s8 + $0xd0] sm:$0xff]  }
 0x6c4   : > { %v3151_v28 = vpack.c.bf16 %v1551_v27, %v1551_v27  ;;  %v3547_v27 = vld [vmem:[%s4408_s27 + $0x40] ss:$16 sps:$4 sm:$0xff]  }
 0x6c5   : > { %v3288_v29 = vpop.f32.mrf.mxu1  ;;  %2116 = vmatpush1.bf16.msra.mxu1 %v3547_v27  ;;  %v3588_v27 = vld [vmem:[%s4448_s8 + $0x90] sm:$0xff]  }
 0x6c6   : > { %1564 = vrot.lane.b32.xlu1 %v3151_v28, %s4023_s3  ;;  %v3550_v28 = vld [vmem:[%s4408_s27 + $0x48] ss:$16 sps:$4 sm:$0xff]   ;;  %v3555_v29 = vld [vmem:[%s4408_s27 + $0x24] ss:$16 sps:$4 sm:$0xff]  }
 0x6c7   : > { %v1554_v30 = vpop.f32.mrf.mxu1  ;;  %2117 = vmatprep.subr.bf16.mxu1 %v3555_v29  ;;  %v3590_v29 = vld [vmem:[%s4448_s8 + $0xc8] sm:$0xff]  }
 0x6c8   : > { %v3152_v34 = vpack.c.bf16 %v1554_v30, %v1554_v30  ;;  %v3553_v30 = vld [vmem:[%s4408_s27 + $0x20] ss:$16 sps:$4 sm:$0xff]  }
 0x6c9   : > { %v3289_v35 = vpop.f32.mrf.mxu1  ;;  %2118 = vmatpush1.bf16.msra.mxu1 %v3553_v30  ;;  %v3592_v30 = vld [vmem:[%s4448_s8 + $0x88] sm:$0xff]  }
 0x6ca   : > { %1566 = vrot.lane.b32.xlu0 %v3152_v34, %s4023_s3  ;;  %v3561_v34 = vld [vmem:[%s4408_s27 + $0x4] ss:$16 sps:$4 sm:$0xff]   ;;  %v3564_v35 = vld [vmem:[%s4408_s27 + $0xc] ss:$16 sps:$4 sm:$0xff]  }
 0x6cb   : > { %v1691_v36 = vpop.f32.mrf.mxu1  ;;  %2119 = vmatprep.subr.bf16.mxu1 %v3561_v34  ;;  %v3594_v34 = vld [vmem:[%s4448_s8 + $0xc0] sm:$0xff]  }
 0x6cc   : > { %v3153_v37 = vpack.c.bf16 %v1691_v36, %v1691_v36  ;;  %v3559_v36 = vld [vmem:[%s4408_s27] ss:$16 sps:$4 sm:$0xff]  }
 0x6cd   : > { %v3300_v38 = vpop.f32.mrf.mxu1  ;;  %2120 = vmatpush1.bf16.msra.mxu1 %v3559_v36  ;;  %v3596_v36 = vld [vmem:[%s4448_s8 + $0x80] sm:$0xff]  }
 0x6ce   : > { %1704 = vrot.lane.b32.xlu1 %v3153_v37, %s4021_s10  ;;  %v3562_v37 = vld [vmem:[%s4408_s27 + $0x8] ss:$16 sps:$4 sm:$0xff]  }
 0x6cf   : > { %v1694_v39 = vpop.f32.mrf.mxu1 }
 0x6d0   : > { %v3154_v41 = vpack.c.bf16 %v1694_v39, %v1694_v39 }
 0x6d1   : > { %v3301_v42 = vpop.f32.mrf.mxu1 }
 0x6d2   : > { %1706 = vrot.lane.b32.xlu0 %v3154_v41, %s4021_s10 }
 0x730   : > { %v1425_v43 = vpop.permute.xlu1 %1424 }
 0x731   : > { %1431 = vst.msk [vmem:[#allocation2] sm:$0xf] %vm1430_vm4, %v1425_v43 }
 0x734   : > { %v1427_v44 = vpop.permute.xlu0 %1426 }
 0x735   : > { %1432 = vst.msk [vmem:[#allocation2 + $0x4] sm:$0xf] %vm1430_vm4, %v1427_v44 }
 0x738   : > { %v1565_v5 = vpop.permute.xlu1 %1564 }
 0x739   : > { %1571 = vst.msk [vmem:[#allocation2] sm:$0xf] %vm1570_vm5, %v1565_v5 }
 0x73c   : > { %v1567_v45 = vpop.permute.xlu0 %1566 }
 0x73d   : > { %1572 = vst.msk [vmem:[#allocation2 + $0x4] sm:$0xf] %vm1570_vm5, %v1567_v45 }
 0x740   : > { %v1705_v46 = vpop.permute.xlu1 %1704 }
 0x741   : > { %1711 = vst.msk [vmem:[#allocation2] sm:$0xf] %vm1710_vm6, %v1705_v46 }
 0x744   : > { %v1707_v47 = vpop.permute.xlu0 %1706 }
 0x745   : > { %1712 = vst.msk [vmem:[#allocation2 + $0x4] sm:$0xf] %vm1710_vm6, %v1707_v47 }
 0x74c   : > { %v3516_v48 = vld [vmem:[#allocation2] sm:$0xff]  }
 0x74d   : > { %3319 = vmatmul.mubr.bf16.vlgmr.msra.gmra.mxu0 %v3516_v48 }
 0x74e   : > { %2180 = vmatprep.mubr.bf16.mxu0 %v4018_v4  ;;  %2149 = vmatpush1.bf16.msra.mxu0 %v3520_v6  ;;  %v3569_v6 = vld [vmem:[%s4448_s8 + $0x70] sm:$0xff]  }
 0x74f   : > { %2150 = vmatprep.subr.bf16.mxu0 %v3528_v8  ;;  %v3571_v8 = vld [vmem:[%s4448_s8 + $0x30] sm:$0xff]  }
 0x752   : > { %2151 = vmatpush1.bf16.msra.mxu0 %v3526_v10  ;;  %v3573_v10 = vld [vmem:[%s4448_s8 + $0x68] sm:$0xff]  }
 0x753   : > { %2152 = vmatprep.subr.bf16.mxu0 %v3534_v12  ;;  %v3575_v12 = vld [vmem:[%s4448_s8 + $0x28] sm:$0xff]  }
 0x756   : > { %2153 = vmatpush1.bf16.msra.mxu0 %v3532_v14  ;;  %v3577_v14 = vld [vmem:[%s4448_s8 + $0x60] sm:$0xff]  }
 0x757   : > { %2154 = vmatprep.subr.bf16.mxu0 %v3540_v18  ;;  %v3581_v18 = vld [vmem:[%s4448_s8 + $0x58] sm:$0xff]  }
 0x75a   : > { %2155 = vmatpush1.bf16.msra.mxu0 %v3538_v17  ;;  %v3580_v17 = vld [vmem:[%s4448_s8 + $0xa0] sm:$0xff]  }
 0x75b   : > { %2156 = vmatprep.subr.bf16.mxu0 %v3546_v20  ;;  %v3583_v20 = vld [vmem:[%s4448_s8 + $0x18] sm:$0xff]  }
 0x75e   : > { %2157 = vmatpush1.bf16.msra.mxu0 %v3544_v22  ;;  %v3585_v22 = vld [vmem:[%s4448_s8 + $0x50] sm:$0xff]  }
 0x75f   : > { %2158 = vmatprep.subr.bf16.mxu0 %v3552_v24  ;;  %v3587_v24 = vld [vmem:[%s4448_s8 + $0x10] sm:$0xff]  }
 0x762   : > { %2159 = vmatpush1.bf16.msra.mxu0 %v3550_v28  ;;  %v3589_v28 = vld [vmem:[%s4448_s8 + $0x48] sm:$0xff]  }
 0x763   : > { %2160 = vmatprep.subr.bf16.mxu0 %v3558_v59  ;;  %v3591_v59 = vld [vmem:[%s4448_s8 + $0x8] sm:$0xff]  }
 0x766   : > { %2161 = vmatpush1.bf16.msra.mxu0 %v3556_v31  ;;  %v3593_v31 = vld [vmem:[%s4448_s8 + $0x40] sm:$0xff]  }
 0x767   : > { %2162 = vmatprep.subr.bf16.mxu0 %v3564_v35  ;;  %v3595_v35 = vld [vmem:[%s4448_s8] sm:$0xff]  }
 0x76a   : > { %2163 = vmatpush1.bf16.msra.mxu0 %v3562_v37  ;;  %v1923_v37 = vld [vmem:[%s4434_s6] sm:$0xf] }
 0x76b   : > { %3212 = vmatprep.subr.bf16.mxu0 %v3566_v1 }
 0x80d   : > { %v1826_v51 = vpop.f32.mrf.mxu0 }
 0x80e   : > { %v1827_v52 = vadd.f32 %v3056_v50, %v1826_v51 }
 0x80f   : > { %v3320_v53 = vpop.f32.mrf.mxu0 }
 0x810   : > { %v1833_v54 = vadd.f32 %v1827_v52, %v4486_v25 }
 0x811   : > { %v1829_v55 = vpop.f32.mrf.mxu0 }
 0x812   : > { %v1830_v56 = vadd.f32 %v3056_v50, %v1829_v55  ;;  %1837 = vadd.xlane.f32.xlu1 %v1833_v54 }
 0x813   : > { %v3321_v58 = vpop.f32.mrf.mxu0 }
 0x814   : > { %v1834_v4 = vadd.f32 %v1830_v56, %v4489_v26  ;;  %v3066_v58 = vld [vmem:[%s4948_s7] ss:$0 sm:$0xff] }
 0x816   : > { %1839 = vadd.xlane.f32.xlu0 %v1834_v4 }
 0x89b   : > { %v1838_v60 = vpop.xlane.xlu1 %1837 }
 0x89c   : > { %v1842_v61 = vmul.f32 0.0078125, %v1838_v60 }
 0x89e   : > { %v4626_v57 = vsub.f32 %v1833_v54, %v1842_v61 }
 0x89f   : > { %v1840_v62 = vpop.xlane.xlu0 %1839 }
 0x8a0   : > { %v1843_v63 = vmul.f32 0.0078125, %v1840_v62  ;;  %v1846_v25 = vmul.f32 %v4626_v57, %v4626_v57  ;;  %v3067_v62 = vld [vmem:[%s862_s21] ss:$0 sm:$0xff] }
 0x8a2   : > { %v4630_v0 = vsub.f32 %v1834_v4, %v1843_v63  ;;  %1848 = vadd.xlane.f32.xlu0 %v1846_v25 }
 0x8a4   : > { %v1847_v26 = vmul.f32 %v4630_v0, %v4630_v0 }
 0x8a6   : > { %1850 = vadd.xlane.f32.xlu0 %v1847_v26 }
 0x92b   : > { %v1849_v38 = vpop.xlane.xlu0 %1848 }
 0x92c   : > { %v1852_v39 = vmul.f32 0.0078125, %v1849_v38  ;;  %v1939_v38 = vsub.s32 3, %v4508_v32 }
 0x92e   : > { %v1854_v41 = vadd.f32 1e-05, %v1852_v39  ;;  %v1928_v39 = vrot.slane %v1923_v37, %v925_v40 }
 0x92f   : > { %v1851_v42 = vpop.xlane.xlu0 %1850 }
 0x930   : > { %3629 = vrsqrt.f32 %v1854_v41  ;;  %v1853_v43 = vmul.f32 0.0078125, %v1851_v42  ;;  %vm1858_vm7 = vcmp.eq.f32.partialorder %v1854_v41, inf  ;;  %v1861_v46 = vand.u32 2147483648, %v1854_v41 }
 0x931   : > { %vm1860_vm8 = vcmp.eq.f32.partialorder %v1854_v41, 0.0 }
 0x932   : > { %v1855_v44 = vadd.f32 1e-05, %v1853_v43 }
 0x934   : > { %3631 = vrsqrt.f32 %v1855_v44  ;;  %vm1865_vm9 = vcmp.eq.f32.partialorder %v1855_v44, inf  ;;  %v1868_v52 = vand.u32 2147483648, %v1855_v44  ;;  %vm1867_vm10 = vcmp.eq.f32.partialorder %v1855_v44, 0.0 }
 0x93d   : > { %v3630_v5 = vpop.eup %3629 }
 0x93e   : > { %v1857_v45 = vmul.f32 %v3630_v5, %v1854_v41  ;;  %v1940_v5 = vrot.slane %v1923_v37, %v1939_v38 }
 0x940   : > { %v1859_v47 = vsel %vm1858_vm7, %v1854_v41, %v1857_v45  ;;  %v1936_v41 = vrot.slane %v1923_v37, %v933_v49 }
 0x941   : > { %v1862_v48 = vsel %vm1860_vm8, %v1861_v46, %v1859_v47  ;;  %v3632_v50 = vpop.eup %3631 }
 0x942   : > { %3633 = vrcp.f32 %v1862_v48  ;;  %v1864_v51 = vmul.f32 %v3632_v50, %v1855_v44 }
 0x944   : > { %v1866_v53 = vsel %vm1865_vm9, %v1855_v44, %v1864_v51  ;;  %v1932_v44 = vrot.slane %v1923_v37, %v929_v33 }
 0x945   : > { %v1869_v54 = vsel %vm1867_vm10, %v1868_v52, %v1866_v53 }
 0x946   : > { %3635 = vrcp.f32 %v1869_v54 }
 0x94f   : > { %v3634_v55 = vpop.eup %3633 }
 0x950   : > { %v1871_v56 = vmul.f32 %v3634_v55, %v4626_v57 }
 0x952   : > { %v1880_v61 = vmul.f32 %v3066_v58, %v1871_v56 }
 0x953   : > { %v3636_v4 = vpop.eup %3635 }
 0x954   : > { %v1873_v60 = vmul.f32 %v3636_v4, %v4630_v0  ;;  %v4678_v25 = vadd.f32 %v3067_v62, %v1880_v61  ;;  %v3565_v0 = vld [vmem:[%s4448_s8 + $0x78] sm:$0xff]  }
 0x955   : > { %3190 = vmatprep.subr.bf16.mxu1 %v3565_v0 }
 0x956   : > { %v1881_v63 = vmul.f32 %v3066_v58, %v1873_v60 }
 0x958   : > { %v4680_v57 = vadd.f32 %v3067_v62, %v1881_v63 }
 0x95a   : > { %v1890_v26 = vpack.c.bf16 %v4680_v57, %v4678_v25 }
 0x95c   : > { %2138 = vmatmul.mubr.bf16.vlgmr.msra.gmra.mxu1 %v1890_v26  ;;  %2181 = vmatmul.mubr.bf16.vlgmr.msra.gmra.mxu0 %v1890_v26 }
 0x95d   : > { %3191 = vmatpush3.bf16.msra.mxu1 %v3567_v2  ;;  %3213 = vmatpush3.bf16.msra.mxu0 %v3568_v3 }
 0x95e   : > { %3192 = vmatprep.subr.bf16.mxu1 %v3569_v6  ;;  %3214 = vmatprep.subr.bf16.mxu0 %v3570_v7 }
 0x961   : > { %3193 = vmatpush3.bf16.msra.mxu1 %v3571_v8  ;;  %3215 = vmatpush3.bf16.msra.mxu0 %v3572_v9 }
 0x962   : > { %3194 = vmatprep.subr.bf16.mxu1 %v3573_v10  ;;  %3216 = vmatprep.subr.bf16.mxu0 %v3574_v11 }
 0x965   : > { %3195 = vmatpush3.bf16.msra.mxu1 %v3575_v12  ;;  %3217 = vmatpush3.bf16.msra.mxu0 %v3576_v13 }
 0x966   : > { %3196 = vmatprep.subr.bf16.mxu1 %v3577_v14  ;;  %3218 = vmatprep.subr.bf16.mxu0 %v3578_v15 }
 0x969   : > { %3197 = vmatpush3.bf16.msra.mxu1 %v3579_v16  ;;  %3219 = vmatpush3.bf16.msra.mxu0 %v3580_v17 }
 0x96a   : > { %3198 = vmatprep.subr.bf16.mxu1 %v3581_v18  ;;  %3220 = vmatprep.subr.bf16.mxu0 %v3582_v19 }
 0x96d   : > { %3199 = vmatpush3.bf16.msra.mxu1 %v3583_v20  ;;  %3221 = vmatpush3.bf16.msra.mxu0 %v3584_v21 }
 0x96e   : > { %3200 = vmatprep.subr.bf16.mxu1 %v3585_v22  ;;  %3222 = vmatprep.subr.bf16.mxu0 %v3586_v23 }
 0x971   : > { %3201 = vmatpush3.bf16.msra.mxu1 %v3587_v24  ;;  %3223 = vmatpush3.bf16.msra.mxu0 %v3588_v27 }
 0x972   : > { %3202 = vmatprep.subr.bf16.mxu1 %v3589_v28  ;;  %3224 = vmatprep.subr.bf16.mxu0 %v3590_v29 }
 0x975   : > { %3203 = vmatpush3.bf16.msra.mxu1 %v3591_v59  ;;  %3225 = vmatpush3.bf16.msra.mxu0 %v3592_v30 }
 0x976   : > { %3204 = vmatprep.subr.bf16.mxu1 %v3593_v31  ;;  %3226 = vmatprep.subr.bf16.mxu0 %v3594_v34 }
 0x979   : > { %3205 = vmatpush3.bf16.msra.mxu1 %v3595_v35  ;;  %3227 = vmatpush3.bf16.msra.mxu0 %v3596_v36 }
 0xa1c   : > { %v2139_v42 = vpop.f32.mrf.mxu1  ;;  %v2182_v43 = vpop.f32.mrf.mxu0 }
 0xa1d   : > { %v2140_v45 = vadd.f32 %v2139_v42, %v1928_v39  ;;  %v2183_v46 = vadd.f32 %v2182_v43, %v1936_v41 }
 0xa1e   : > { %v2141_v47 = vpop.f32.mrf.mxu1  ;;  %v2184_v48 = vpop.f32.mrf.mxu0 }
 0xa1f   : > { %v2199_v50 = vmul.f32 0.70710677, %v2140_v45  ;;  %v2201_v51 = vmul.f32 0.70710677, %v2183_v46  ;;  %v2142_v52 = vadd.f32 %v2141_v47, %v1932_v44  ;;  %v2185_v53 = vadd.f32 %v2184_v48, %v1940_v5 }
 0xa20   : > { %v2143_v54 = vpop.f32.mrf.mxu1  ;;  %v2186_v55 = vpop.f32.mrf.mxu0  ;;  %v2191_v8 = vmul.f32 0.5, %v2140_v45  ;;  %v2193_v28 = vmul.f32 0.5, %v2183_v46 }
 0xa21   : > { %v2144_v40 = vadd.f32 %v2143_v54, %v1928_v39  ;;  %v2187_v56 = vadd.f32 %v2186_v55, %v1936_v41  ;;  %3637 = verf.f32 %v2199_v50  ;;  %v2200_v49 = vmul.f32 0.70710677, %v2142_v52 }
 0xa22   : > { %v2145_v58 = vpop.f32.mrf.mxu1  ;;  %v2188_v4 = vpop.f32.mrf.mxu0  ;;  %3639 = verf.f32 %v2201_v51  ;;  %v2202_v32 = vmul.f32 0.70710677, %v2185_v53  ;;  %v2192_v9 = vmul.f32 0.5, %v2142_v52  ;;  %v2194_v22 = vmul.f32 0.5, %v2185_v53 }
 0xa23   : > { %v2203_v33 = vmul.f32 0.70710677, %v2144_v40  ;;  %3641 = verf.f32 %v2200_v49  ;;  %v2205_v60 = vmul.f32 0.70710677, %v2187_v56  ;;  %v2146_v61 = vadd.f32 %v2145_v58, %v1932_v44  ;;  %v3100_v44 = vld [vmem:[%s869_s4] ss:$0 sm:$0xff] }
 0xa24   : > { %v2189_v62 = vadd.f32 %v2188_v4, %v1940_v5  ;;  %3643 = verf.f32 %v2202_v32  ;;  %v2195_v15 = vmul.f32 0.5, %v2144_v40  ;;  %v2197_v19 = vmul.f32 0.5, %v2187_v56 }
 0xa25   : > { %3645 = verf.f32 %v2203_v33  ;;  %v2204_v63 = vmul.f32 0.70710677, %v2146_v61  ;;  %v2196_v20 = vmul.f32 0.5, %v2146_v61 }
 0xa26   : > { %3647 = verf.f32 %v2205_v60  ;;  %v2206_v26 = vmul.f32 0.70710677, %v2189_v62  ;;  %v2198_v24 = vmul.f32 0.5, %v2189_v62 }
 0xa27   : > { %3649 = verf.f32 %v2204_v63 }
 0xa28   : > { %3651 = verf.f32 %v2206_v26 }
 0xa2e   : > { %v3638_v0 = vpop.eup %3637 }
 0xa2f   : > { %v3640_v1 = vpop.eup %3639  ;;  %v2215_v13 = vadd.f32 1.0, %v3638_v0 }
 0xa30   : > { %v3642_v2 = vpop.eup %3641  ;;  %v2217_v18 = vadd.f32 1.0, %v3640_v1 }
 0xa31   : > { %v3644_v3 = vpop.eup %3643  ;;  %v2216_v10 = vadd.f32 1.0, %v3642_v2  ;;  %v2223_v31 = vmul.f32 %v2215_v13, %v2191_v8 }
 0xa32   : > { %v3646_v6 = vpop.eup %3645  ;;  %v2218_v14 = vadd.f32 1.0, %v3644_v3  ;;  %v2225_v36 = vmul.f32 %v2217_v18, %v2193_v28  ;;  %v3133_v18 = vld [vmem:[%s872_s30] ss:$0 sm:$0xff] }
 0xa33   : > { %v3648_v7 = vpop.eup %3647  ;;  %v2219_v11 = vadd.f32 1.0, %v3646_v6  ;;  %v2224_v29 = vmul.f32 %v2216_v10, %v2192_v9 }
 0xa34   : > { %v3650_v12 = vpop.eup %3649  ;;  %v2221_v16 = vadd.f32 1.0, %v3648_v7  ;;  %v2226_v34 = vmul.f32 %v2218_v14, %v2194_v22 }
 0xa35   : > { %v3652_v17 = vpop.eup %3651  ;;  %v2220_v21 = vadd.f32 1.0, %v3650_v12  ;;  %v2227_v23 = vmul.f32 %v2219_v11, %v2195_v15 }
 0xa36   : > { %v2222_v27 = vadd.f32 1.0, %v3652_v17  ;;  %v2229_v59 = vmul.f32 %v2221_v16, %v2197_v19 }
 0xa37   : > { %v2228_v30 = vmul.f32 %v2220_v21, %v2196_v20  ;;  %v2231_v38 = vpack.c.bf16 %v2227_v23, %v2223_v31  ;;  %v3134_v20 = vld [vmem:[%s875_s22] ss:$0 sm:$0xff]  ;;  %s4954_s22 = sld [smem:[#allocation55_spill]] (!%p3135_p4) }
 0xa38   : > { %v2230_v35 = vmul.f32 %v2222_v27, %v2198_v24  ;;  %v2233_v41 = vpack.c.bf16 %v2229_v59, %v2225_v36 }
 0xa39   : > { %v2232_v37 = vpack.c.bf16 %v2228_v30, %v2224_v29 }
 0xa3a   : > { %v2234_v39 = vpack.c.bf16 %v2230_v35, %v2226_v34 }
 0xa3b   : > { %2530 = vmatprep.mubr.bf16.mxu1 %v2232_v37 }
 0xa3c   : > { %2571 = vmatprep.mubr.bf16.mxu0 %v2234_v39  ;;  %2531 = vmatmul.mubr.bf16.vlgmr.msra.gmra.mxu1 %v2231_v38 }
 0xa3d   : > { %2572 = vmatmul.mubr.bf16.vlgmr.msra.gmra.mxu0 %v2233_v41 }
 0xafc   : > { %v3206_v42 = vpop.f32.mrf.mxu1 }
 0xafd   : > { %v3228_v43 = vpop.f32.mrf.mxu0 }
 0xafe   : > { %v3207_v5 = vpop.f32.mrf.mxu1 }
 0xaff   : > { %v3208_v45 = vadd.f32 %v3207_v5, %v3206_v42  ;;  %v3229_v46 = vpop.f32.mrf.mxu0 }
 0xb00   : > { %v3209_v47 = vpop.f32.mrf.mxu1  ;;  %v3230_v50 = vadd.f32 %v3229_v46, %v3228_v43 }
 0xb01   : > { %v2533_v48 = vadd.f32 %v3208_v45, %v3100_v44  ;;  %v3231_v51 = vpop.f32.mrf.mxu0 }
 0xb02   : > { %v3210_v52 = vpop.f32.mrf.mxu1 }
 0xb03   : > { %v2574_v53 = vadd.f32 %v3230_v50, %v2533_v48  ;;  %v3211_v54 = vadd.f32 %v3210_v52, %v3209_v47  ;;  %v3232_v55 = vpop.f32.mrf.mxu0 }
 0xb04   : > { %v3233_v56 = vadd.f32 %v3232_v55, %v3231_v51 }
 0xb05   : > { %v2536_v40 = vadd.f32 %v3211_v54, %v3100_v44  ;;  %v2580_v49 = vadd.f32 %v2574_v53, %v4678_v25 }
 0xb07   : > { %v2577_v58 = vadd.f32 %v3233_v56, %v2536_v40  ;;  %2584 = vadd.xlane.f32.xlu1 %v2580_v49 }
 0xb09   : > { %v2581_v4 = vadd.f32 %v2577_v58, %v4680_v57 }
 0xb0b   : > { %2586 = vadd.xlane.f32.xlu0 %v2581_v4 }
 0xb90   : > { %v2585_v32 = vpop.xlane.xlu1 %2584 }
 0xb91   : > { %v2588_v33 = vmul.f32 0.0078125, %v2585_v32 }
 0xb93   : > { %v2590_v60 = vsub.f32 %v2580_v49, %v2588_v33 }
 0xb94   : > { %v2587_v61 = vpop.xlane.xlu0 %2586 }
 0xb95   : > { %v2589_v62 = vmul.f32 0.0078125, %v2587_v61  ;;  %v2592_v63 = vmul.f32 %v2590_v60, %v2590_v60 }
 0xb97   : > { %v2591_v26 = vsub.f32 %v2581_v4, %v2589_v62  ;;  %2594 = vadd.xlane.f32.xlu1 %v2592_v63 }
 0xb99   : > { %v2593_v0 = vmul.f32 %v2591_v26, %v2591_v26 }
 0xb9b   : > { %2596 = vadd.xlane.f32.xlu0 %v2593_v0 }
 0xc20   : > { %v2595_v1 = vpop.xlane.xlu1 %2594 }
 0xc21   : > { %v2598_v2 = vmul.f32 0.0078125, %v2595_v1 }
 0xc23   : > { %v2600_v3 = vadd.f32 1e-05, %v2598_v2 }
 0xc24   : > { %v2597_v6 = vpop.xlane.xlu0 %2596 }
 0xc25   : > { %3653 = vrsqrt.f32 %v2600_v3  ;;  %v2599_v25 = vmul.f32 0.0078125, %v2597_v6  ;;  %vm2604_vm11 = vcmp.eq.f32.partialorder %v2600_v3, inf  ;;  %v2607_v9 = vand.u32 2147483648, %v2600_v3 }
 0xc26   : > { %vm2606_vm12 = vcmp.eq.f32.partialorder %v2600_v3, 0.0 }
 0xc27   : > { %v2601_v7 = vadd.f32 1e-05, %v2599_v25 }
 0xc29   : > { %3655 = vrsqrt.f32 %v2601_v7  ;;  %vm2611_vm13 = vcmp.eq.f32.partialorder %v2601_v7, inf  ;;  %v2614_v14 = vand.u32 2147483648, %v2601_v7  ;;  %vm2613_vm14 = vcmp.eq.f32.partialorder %v2601_v7, 0.0 }
 0xc32   : > { %v3654_v57 = vpop.eup %3653 }
 0xc33   : > { %v2603_v8 = vmul.f32 %v3654_v57, %v2600_v3 }
 0xc35   : > { %v2605_v10 = vsel %vm2604_vm11, %v2600_v3, %v2603_v8 }
 0xc36   : > { %v2608_v11 = vsel %vm2606_vm12, %v2607_v9, %v2605_v10  ;;  %v3656_v12 = vpop.eup %3655 }
 0xc37   : > { %3657 = vrcp.f32 %v2608_v11  ;;  %v2610_v13 = vmul.f32 %v3656_v12, %v2601_v7 }
 0xc39   : > { %v2612_v15 = vsel %vm2611_vm13, %v2601_v7, %v2610_v13 }
 0xc3a   : > { %v2615_v16 = vsel %vm2613_vm14, %v2614_v14, %v2612_v15 }
 0xc3b   : > { %3659 = vrcp.f32 %v2615_v16 }
 0xc44   : > { %v3658_v17 = vpop.eup %3657 }
 0xc45   : > { %v2617_v19 = vmul.f32 %v3658_v17, %v2590_v60 }
 0xc47   : > { %v2626_v21 = vmul.f32 %v3133_v18, %v2617_v19 }
 0xc48   : > { %v3660_v22 = vpop.eup %3659 }
 0xc49   : > { %v2634_v23 = vadd.f32 %v3134_v20, %v2626_v21  ;;  %v2619_v24 = vmul.f32 %v3660_v22, %v2591_v26 }
 0xc4b   : > { %2636 = vst [vmem:[%s4452_s25] sm:$0xff] %v2634_v23  ;;  %v2627_v27 = vmul.f32 %v3133_v18, %v2619_v24  ;;  %2641 = sbr.rel (%p3135_p4) target bundleno = 3481 (0xd99), region = 120 }
 0xc4d   : > { %v2635_v28 = vadd.f32 %v3134_v20, %v2627_v27 }
 0xc4f   : > { %2637 = vst [vmem:[%s4452_s25 + $0x8] sm:$0xff] %v2635_v28 }
 0xc50   : > { %2644 = vadd.xlane.f32.xlu0 %v2634_v23  ;;  %v3136_v40 = vld [vmem:[%s4954_s22] ss:$0 sm:$0xff] }
 0xc51   : > { %v3137_v49 = vld [vmem:[%s4955_s9] ss:$0 sm:$0xff] }
 0xc54   : > { %2646 = vadd.xlane.f32.xlu0 %v2635_v28 }
 0xcd9   : > { %v2645_v29 = vpop.xlane.xlu0 %2644 }
 0xcda   : > { %v2648_v59 = vmul.f32 0.0078125, %v2645_v29 }
 0xcdc   : > { %v2650_v30 = vsub.f32 %v2634_v23, %v2648_v59 }
 0xcdd   : > { %v2647_v31 = vpop.xlane.xlu0 %2646 }
 0xcde   : > { %v2649_v34 = vmul.f32 0.0078125, %v2647_v31  ;;  %v2652_v35 = vmul.f32 %v2650_v30, %v2650_v30 }
 0xce0   : > { %v2651_v36 = vsub.f32 %v2635_v28, %v2649_v34  ;;  %2654 = vadd.xlane.f32.xlu1 %v2652_v35 }
 0xce2   : > { %v2653_v37 = vmul.f32 %v2651_v36, %v2651_v36 }
 0xce4   : > { %2656 = vadd.xlane.f32.xlu1 %v2653_v37 }
 0xd69   : > { %v2655_v38 = vpop.xlane.xlu1 %2654 }
 0xd6a   : > { %v2658_v39 = vmul.f32 0.0078125, %v2655_v38 }
 0xd6c   : > { %v2660_v41 = vadd.f32 1e-05, %v2658_v39 }
 0xd6d   : > { %v2657_v42 = vpop.xlane.xlu1 %2656 }
 0xd6e   : > { %3661 = vrsqrt.f32 %v2660_v41  ;;  %v2659_v43 = vmul.f32 0.0078125, %v2657_v42  ;;  %vm2664_vm15 = vcmp.eq.f32.partialorder %v2660_v41, inf  ;;  %v2667_v46 = vand.u32 2147483648, %v2660_v41 }
 0xd6f   : > { %vm2666_vm0 = vcmp.eq.f32.partialorder %v2660_v41, 0.0 }
 0xd70   : > { %v2661_v44 = vadd.f32 1e-05, %v2659_v43 }
 0xd72   : > { %3663 = vrsqrt.f32 %v2661_v44  ;;  %vm2671_vm1 = vcmp.eq.f32.partialorder %v2661_v44, inf  ;;  %v2674_v52 = vand.u32 2147483648, %v2661_v44  ;;  %vm2673_vm2 = vcmp.eq.f32.partialorder %v2661_v44, 0.0 }
 0xd7b   : > { %v3662_v5 = vpop.eup %3661 }
 0xd7c   : > { %v2663_v45 = vmul.f32 %v3662_v5, %v2660_v41 }
 0xd7e   : > { %v2665_v47 = vsel %vm2664_vm15, %v2660_v41, %v2663_v45 }
 0xd7f   : > { %v2668_v48 = vsel %vm2666_vm0, %v2667_v46, %v2665_v47  ;;  %v3664_v50 = vpop.eup %3663 }
 0xd80   : > { %3665 = vrcp.f32 %v2668_v48  ;;  %v2670_v51 = vmul.f32 %v3664_v50, %v2661_v44 }
 0xd82   : > { %v2672_v53 = vsel %vm2671_vm1, %v2661_v44, %v2670_v51 }
 0xd83   : > { %v2675_v54 = vsel %vm2673_vm2, %v2674_v52, %v2672_v53 }
 0xd84   : > { %3667 = vrcp.f32 %v2675_v54 }
 0xd8d   : > { %v3666_v55 = vpop.eup %3665 }
 0xd8e   : > { %v2677_v56 = vmul.f32 %v3666_v55, %v2650_v30 }
 0xd90   : > { %v2686_v58 = vmul.f32 %v3136_v40, %v2677_v56 }
 0xd91   : > { %v3668_v4 = vpop.eup %3667 }
 0xd92   : > { %v2694_v32 = vadd.f32 %v3137_v49, %v2686_v58  ;;  %v2679_v33 = vmul.f32 %v3668_v4, %v2651_v36 }
 0xd94   : > { %2696 = vst [vmem:[%s4452_s25] sm:$0xff] %v2694_v32  ;;  %v2687_v60 = vmul.f32 %v3136_v40, %v2679_v33 }
 0xd96   : > { %v2695_v61 = vadd.f32 %v3137_v49, %v2687_v60 }
 0xd98   : > { %2697 = vst [vmem:[%s4452_s25 + $0x8] sm:$0xff] %v2695_v61 }
 0xd99 PF: > { %s4956_s3 = sld [smem:[#allocation28_spill]]  ;;  %s2712_s20 = sshll.u32 %s4452_s25, 4  ;;  %s4759_s20 = int_to_ptr.vmem [resolvable:$true] %s2712_s20 }
 0xd9a   : > { %s4958_s1 = sld [smem:[#allocation57_spill]]  ;;  %s2699_s7 = scalar_lea.sflag [#allocation5], %s4375_s12 }
 0xd9b   : > { %s3865_s24 = scalar_lea.vmem %s4759_s20, 256  ;;  %s4024_s11 = smov [#allocation15]  }
 0xd9c   : > { %p3866_p1 = scmp.ne.s32.totalorder %s4759_s20, %s3865_s24  ;;  %s3869_s17 = sshll.u32 %s4024_s11, 4  ;;  %s3870_s17 = int_to_ptr.vmem [resolvable:$false] %s3869_s17 }
 0xd9d   : > { %s3871_s21 = scalar_lea.vmem %s3870_s17, 512  ;;  %p3872_p3 = scmp.lt.s32.totalorder %s4759_s20, %s3870_s17 }
 0xd9e   : > { %p3867_p9 = pnand %p3866_p1, %p4204_p12  ;;  %p3873_p6 = scmp.lt.s32.totalorder %s3871_s21, %s3865_s24 }
 0xd9f   : > { %s3155_s26 = sshll.u32 %s4956_s3, 8 }
 0xda0   : > { %s4756_s27 = scalar_lea.hbm %s4958_s1, %s3155_s26  ;;  %p3868_p10 = pneg %p3867_p9 }
 0xda1   : > { %p3874_p7 = por %p3873_p6, %p3872_p3 }
 0xda3   : > { %p3875_p8 = pnand %p3874_p7, %p3868_p10 }
 0xda5   : > { %3878 = shalt.err (!%p3875_p8)
}
 0xda6   : > { %s3879_s25 = scalar_lea.hbm %s4756_s27, 256  ;;  %s3883_s4 = scalar_lea.hbm %s4958_s1, 512 }
 0xda7   : > { %p3880_p13 = scmp.ne.s32.totalorder %s4756_s27, %s3879_s25  ;;  %p3884_p0 = scmp.lt.s32.totalorder %s4756_s27, %s4958_s1 }
 0xda8   : > { %p3885_p11 = scmp.lt.s32.totalorder %s3883_s4, %s3879_s25 }
 0xda9   : > { %p3881_p2 = pnand %p3880_p13, %p4204_p12 }
 0xdaa   : > { %p3886_p4 = por %p3885_p11, %p3884_p0 }
 0xdab   : > { %p3882_p5 = pneg %p3881_p2 }
 0xdad   : > { %p3887_p1 = pnand %p3886_p4, %p3882_p5 }
 0xdaf   : > { %3890 = shalt.err (!%p3887_p1)
}
 0xdb0   : > { %s4025_s18 = smov 128   ;;  %s4026_s28 = smov 8  }
 0xdb1   : > { %3342 = dma.vmem_to_hbm [thread:$0]  (%p4204_p12), %s4759_s20, 256, %s4756_s27, %s2699_s7, %s4025_s18, %s4025_s18, %s4026_s28  }
 0xdb2 PF: > { %s4959_s8 = sld [smem:[#allocation30_spill]] }
 0xdb3   : > { %s4960_s15 = sld [smem:[#allocation24_spill]] }
 0xdb4   : > { %s4961_s30 = sld [smem:[#allocation35_spill]] }
 0xdb8   : > { %p3371_p9 = scmp.ge.s32.totalorder %s4959_s8, 2 }
 0xdb9   : > { %s2727_s13 = sand.u32 1, %s4960_s15  }
 0xdba   : > { %p4962_p10 = scmp.ne.s32.totalorder %s4961_s30, 0  ;;  %s2728_s22 = scalar_lea.sflag [#allocation5], %s2727_s13 }
 0xdbc   : > { %p3367_p3 = pnand %p3371_p9, %p4962_p10 }
 0xdbe   : > { %p3368_p6 = pneg %p3367_p3 }
 0xdc0   : > { %3956 = dma.done.wait (%p3368_p6), %s2728_s22, 256  }
 0xdc1   : > { %3958 = vsyncadd (%p3368_p6), %s2728_s22, 4294967040  ;;  %s41_s0 = sadd.s32 1, %s4959_s8   ;;  %s4963_s21 = sld [smem:[#allocation22_spill]] }
 0xdc2   : > { %p38_p7 = scmp.ge.s32.totalorder %s41_s0, 6   ;;  %s4964_s22 = sld [smem:[#allocation23_spill]] }
 0xdc3   : > { %s4965_s23 = sld [smem:[#allocation39_spill]]  ;;  %s4972_s27 = smov %s3993_s29 }
 0xdc4   : > { %s4966_s24 = sld [smem:[#allocation25_spill]] }
 0xdc5   : > { %s4967_s25 = sld [smem:[#allocation26_spill]] }
 0xdc6   : > { %s4968_s26 = sld [smem:[#allocation40_spill]] }
 0xdc7   : > { %s4969_s28 = sld [smem:[#allocation29_spill]] }
 0xdc8   : > { %s4970_s12 = sld [smem:[#allocation37_spill]] }
 0xdc9   : > { %s4971_s30 = sld [smem:[#allocation38_spill]] }
 0xdca   :  { %40 = sbr.rel (!%p38_p7) target bundleno = 33 (0x21), region = 230 }
 0xdce   : > { %s4973_s29 = smov %s4970_s12 }
 0xdcf   :  { %2733 = vsyncpa [#allocation4], 1 }
 0xdd0   :  { %2735 = vsyncpa [#allocation4 + $0x1], 1 }
 0xdd1   :  { %2736 = vsyncpa [#allocation7], 1 }
 0xdd2   :  { %2738 = vsyncpa [#allocation7 + $0x1], 1 }
 0xdd3   :  { %2739 = vsyncpa [#allocation10], 1 }
 0xdd4   :  { %2741 = vsyncpa [#allocation10 + $0x1], 1 }
 0xdd5   :  { %2742 = vsyncpa [#allocation13], 1 }
 0xdd6   :  { %2744 = vsyncpa [#allocation13 + $0x1], 1 }
 0xdd7   :  { %2745 = vsyncpa [#allocation5], 1 }
 0xdd8   :  { %2747 = vsyncpa [#allocation5 + $0x1], 1 }

</bundles_post_ra>
